<compile_context>
chip_gen: v6e
topology: v6e:2x2x1
jax: 0.10.0
libtpu: 0.0.40
codegen_flags: <defaults>
</compile_context>

<pallas_src>
import functools

import numpy as np
import jax
import jax.numpy as jnp
from jax.experimental import pallas as pl
from jax.experimental.pallas import tpu as pltpu

FEA_DIM = 9              # per-point feature dim ("9 features" per the docstring)
FEA_PAD = 16             # first-layer input channels padded 9 -> 16 (zero rows in W1)
HID1, HID2, HID3 = 64, 128, 256
OUT_PT_FEA_DIM = 64
EPS = 1e-5
NEG_INF = -3.4e38
TILE_N = 512             # point-tile size (rows) for all N-tiled kernels


def _round_up(x, m):
    return (x + m - 1) // m * m


# ----------------------------------------------------------------------------
# Kernel 1: per-layer BatchNorm statistics (masked column sum / sum-of-squares),
# accumulated into a resident (2, C) block over an "arbitrary" N-tile grid.
# ----------------------------------------------------------------------------
def stats_kernel(n_ref, x_ref, s_ref):
    g = pl.program_id(0)

    @pl.when(g == 0)
    def _():
        s_ref[...] = jnp.zeros_like(s_ref)

    tn = x_ref.shape[0]
    row = jax.lax.broadcasted_iota(jnp.int32, (tn, 1), 0) + g * tn
    xm = jnp.where(row < n_ref[0], x_ref[...], 0.0)          # mask padded rows
    upd = jnp.concatenate([jnp.sum(xm, axis=0, keepdims=True),
                           jnp.sum(xm * xm, axis=0, keepdims=True)], axis=0)
    s_ref[...] = s_ref[...] + upd


def stats_call(n_arr, h, tn):
    n_pad, c = h.shape
    return pl.pallas_call(
        stats_kernel,
        out_shape=jax.ShapeDtypeStruct((2, c), jnp.float32),
        grid_spec=pltpu.PrefetchScalarGridSpec(
            num_scalar_prefetch=1,
            grid=(n_pad // tn,),
            in_specs=[pl.BlockSpec((tn, c), lambda g, n: (g, 0))],
            out_specs=pl.BlockSpec((2, c), lambda g, n: (0, 0))),
        compiler_params=pltpu.CompilerParams(dimension_semantics=("arbitrary",)),
        cost_estimate=pl.CostEstimate(flops=3 * n_pad * c, transcendentals=0,
                                      bytes_accessed=4 * (n_pad * c + 2 * c)),
    )(n_arr, h)


# ----------------------------------------------------------------------------
# Kernel 2: fused BN-affine (+optional ReLU) + bf16 matmul + bias, tiled over N.
# scale/shift fold mean/var/gamma/beta into one multiply-add per element.
# ----------------------------------------------------------------------------
def apply_kernel(h_ref, scale_ref, shift_ref, w_ref, b_ref, o_ref, *, relu):
    z = h_ref[...] * scale_ref[...] + shift_ref[...]
    if relu:
        z = jnp.maximum(z, 0.0)
    acc = jnp.dot(z.astype(jnp.bfloat16), w_ref[...],
                  preferred_element_type=jnp.float32)
    o_ref[...] = acc + b_ref[...]


def apply_call(h, scale, shift, w_bf16, bias, *, relu, tn):
    n_pad, cin = h.shape
    cout = w_bf16.shape[1]
    return pl.pallas_call(
        functools.partial(apply_kernel, relu=relu),
        out_shape=jax.ShapeDtypeStruct((n_pad, cout), jnp.float32),
        grid_spec=pltpu.PrefetchScalarGridSpec(
            num_scalar_prefetch=0,
            grid=(n_pad // tn,),
            in_specs=[pl.BlockSpec((tn, cin), lambda g: (g, 0)),
                      pl.BlockSpec((1, cin), lambda g: (0, 0)),
                      pl.BlockSpec((1, cin), lambda g: (0, 0)),
                      pl.BlockSpec((cin, cout), lambda g: (0, 0)),
                      pl.BlockSpec((1, cout), lambda g: (0, 0))],
            out_specs=pl.BlockSpec((tn, cout), lambda g: (g, 0))),
        compiler_params=pltpu.CompilerParams(dimension_semantics=("parallel",)),
        cost_estimate=pl.CostEstimate(
            flops=2 * n_pad * cin * cout, transcendentals=0,
            bytes_accessed=4 * n_pad * (cin + cout) + 2 * cin * cout),
    )(h, scale, shift, w_bf16, bias)


# ----------------------------------------------------------------------------
# Kernel 3: sorted segment max (torch_scatter.scatter_max, dim=0).
# Points are sorted by their unique-voxel id; padded points map to a dump row.
# ----------------------------------------------------------------------------
def scatter_max_kernel(inv_ref, feat_ref, out_ref):
    g = pl.program_id(0)
    tn = feat_ref.shape[0]

    @pl.when(g == 0)
    def _():
        # TODO(synk): empty segments would keep -3.4e38 here (never happens:
        # every unique voxel has >= 1 point and the dump row is sliced off).
        out_ref[...] = jnp.full(out_ref.shape, NEG_INF, dtype=out_ref.dtype)

    base = g * tn

    def group_body(grp, carry):
        off = pl.multiple_of(grp * 8, 8)
        lo = inv_ref[base + off]
        hi = inv_ref[base + off + 7]

        # fast path: all 8 sorted points share one voxel -> one sublane reduce
        # + one full-row RMW (full (1,64) store instead of 8 masked stores).
        @pl.when(lo == hi)
        def _():
            gmax = jnp.max(feat_ref[pl.ds(off, 8), :], axis=0, keepdims=True)
            out_ref[pl.ds(lo, 1), :] = jnp.maximum(out_ref[pl.ds(lo, 1), :], gmax)

        # fallback: group spans several voxels -> per-point single-row RMW.
        @pl.when(lo != hi)
        def _():
            for i in range(8):
                r = inv_ref[base + off + i]
                fi = feat_ref[pl.ds(off + i, 1), :]
                out_ref[pl.ds(r, 1), :] = jnp.maximum(out_ref[pl.ds(r, 1), :], fi)

        return carry

    jax.lax.fori_loop(0, tn // 8, group_body, 0)


def scatter_max_call(inv_pad, feat, m_out_pad, tn):
    n_pad, c = feat.shape
    # TODO(synk): inv lives whole in SMEM and the (M,64) accumulator whole in
    # VMEM; for very large N / M tile both (per-block ids via scalar prefetch).
    return pl.pallas_call(
        scatter_max_kernel,
        out_shape=jax.ShapeDtypeStruct((m_out_pad, c), jnp.float32),
        grid_spec=pltpu.PrefetchScalarGridSpec(
            num_scalar_prefetch=1,
            grid=(n_pad // tn,),
            in_specs=[pl.BlockSpec((tn, c), lambda g, inv: (g, 0))],
            out_specs=pl.BlockSpec((m_out_pad, c), lambda g, inv: (0, 0))),
        compiler_params=pltpu.CompilerParams(dimension_semantics=("arbitrary",)),
    )(inv_pad, feat)


# ----------------------------------------------------------------------------
# PPmodel orchestration: 4 x (stats -> fold into scale/shift -> apply)
# ----------------------------------------------------------------------------
def ppmodel_forward(n_arr, n, x_pad, p, tn):
    nf = float(n)

    def affine(stats, gamma, beta):
        mean = stats[0:1, :] / nf
        var = jnp.maximum(stats[1:2, :] / nf - mean * mean, 0.0)   # biased var
        rstd = jax.lax.rsqrt(var + EPS)
        scale = rstd * gamma.reshape(1, -1)
        shift = beta.reshape(1, -1) - mean * scale
        return scale, shift

    # pad BN0 / Lin1 from 9 -> 16 input channels (zero weight rows => no effect)
    g0 = jnp.ones((FEA_PAD,), jnp.float32).at[:FEA_DIM].set(p["bn0_w"])
    b0 = jnp.zeros((FEA_PAD,), jnp.float32).at[:FEA_DIM].set(p["bn0_b"])
    w1 = jnp.zeros((FEA_PAD, HID1), jnp.float32).at[:FEA_DIM].set(
        p["lin1_w"]).astype(jnp.bfloat16)
    w2 = p["lin2_w"].astype(jnp.bfloat16)
    w3 = p["lin3_w"].astype(jnp.bfloat16)
    w4 = p["lin4_w"].astype(jnp.bfloat16)
    r = lambda v: v.reshape(1, -1).astype(jnp.float32)

    h = x_pad
    sc, sh = affine(stats_call(n_arr, h, tn), g0, b0)
    h = apply_call(h, sc, sh, w1, r(p["lin1_b"]), relu=False, tn=tn)
    sc, sh = affine(stats_call(n_arr, h, tn), p["bn1_w"], p["bn1_b"])
    h = apply_call(h, sc, sh, w2, r(p["lin2_b"]), relu=True, tn=tn)
    sc, sh = affine(stats_call(n_arr, h, tn), p["bn2_w"], p["bn2_b"])
    h = apply_call(h, sc, sh, w3, r(p["lin3_b"]), relu=True, tn=tn)
    sc, sh = affine(stats_call(n_arr, h, tn), p["bn3_w"], p["bn3_b"])
    h = apply_call(h, sc, sh, w4, r(p["lin4_b"]), relu=True, tn=tn)
    return h


# ----------------------------------------------------------------------------
# Glue (concat / shuffle / unique / sort-by-voxel) + full forward
# ----------------------------------------------------------------------------
def _prepare(pt_fea_list, xy_ind_list, perm_key):
    cat_fea = jnp.concatenate(pt_fea_list, axis=0)
    cat_ind = jnp.concatenate(
        [jnp.pad(ind, ((0, 0), (1, 0)), constant_values=i)    # F.pad((1,0), value=i_batch)
         for i, ind in enumerate(xy_ind_list)], axis=0)
    n = cat_fea.shape[0]
    perm = jax.random.permutation(perm_key, n)                 # deterministic "randperm"
    cat_fea = cat_fea[perm]
    cat_ind = cat_ind[perm]
    # torch.unique(dim=0, return_inverse=True) -> data-dependent shape, host glue
    unq, unq_inv = np.unique(np.asarray(cat_ind), axis=0, return_inverse=True)
    return cat_fea, unq.astype(np.int64), np.asarray(unq_inv).reshape(-1).astype(np.int64)


def cylinder_fea_forward(pt_fea_list, xy_ind_list, params, perm_key,
                         grid_size=(8, 8, 4), fea_compre=None):
    # grid_size / local_pool_op / fea_compre=None are unused in the reference forward
    del grid_size, fea_compre
    cat_fea, unq, unq_inv = _prepare(pt_fea_list, xy_ind_list, perm_key)
    n = int(cat_fea.shape[0])
    m = int(unq.shape[0])

    # sort points by unique-voxel id (BN stats / per-row MLP / max are order-invariant)
    order = np.argsort(unq_inv, kind="stable")
    cat_fea = jnp.asarray(cat_fea)[jnp.asarray(order.astype(np.int32))]
    inv_sorted = unq_inv[order].astype(np.int32)

    tn = min(TILE_N, _round_up(n, 8))
    n_pad = _round_up(n, tn)
    m_out_pad = _round_up(m + 1, 8)      # +1 row reserved as a dump for padded points
    dump_row = m

    x_pad = jnp.zeros((n_pad, FEA_PAD), jnp.float32).at[:n, :FEA_DIM].set(cat_fea)
    inv_pad = jnp.full((n_pad,), dump_row, jnp.int32).at[:n].set(jnp.asarray(inv_sorted))
    n_arr = jnp.array([n], jnp.int32)

    processed = ppmodel_forward(n_arr, n, x_pad, params, tn)        # (n_pad, 64)
    pooled = scatter_max_call(inv_pad, processed, m_out_pad, tn)    # (m_out_pad, 64)
    return unq, pooled[:m]


# ----------------------------------------------------------------------------
# Deterministic parameter init (PyTorch defaults: Linear U(+-1/sqrt(fan_in)),
# BatchNorm weight=1 / bias=0).  Linear weights stored as [C_in, C_out].
# ----------------------------------------------------------------------------
def init_params(key):
    def lin(k, fan_in, fan_out):
        k1, k2 = jax.random.split(k)
        bound = 1.0 / np.sqrt(fan_in)
        w = jax.random.uniform(k1, (fan_in, fan_out), jnp.float32, -bound, bound)
        b = jax.random.uniform(k2, (fan_out,), jnp.float32, -bound, bound)
        return w, b

    keys = jax.random.split(key, 4)
    p = {"bn0_w": jnp.ones((FEA_DIM,), jnp.float32),
         "bn0_b": jnp.zeros((FEA_DIM,), jnp.float32),
         "bn1_w": jnp.ones((HID1,), jnp.float32), "bn1_b": jnp.zeros((HID1,), jnp.float32),
         "bn2_w": jnp.ones((HID2,), jnp.float32), "bn2_b": jnp.zeros((HID2,), jnp.float32),
         "bn3_w": jnp.ones((HID3,), jnp.float32), "bn3_b": jnp.zeros((HID3,), jnp.float32)}
    p["lin1_w"], p["lin1_b"] = lin(keys[0], FEA_DIM, HID1)
    p["lin2_w"], p["lin2_b"] = lin(keys[1], HID1, HID2)
    p["lin3_w"], p["lin3_b"] = lin(keys[2], HID2, HID3)
    p["lin4_w"], p["lin4_b"] = lin(keys[3], HID3, OUT_PT_FEA_DIM)
    return p


# ----------------------------------------------------------------------------
# Pure numpy (float64) reference for correctness checking
# ----------------------------------------------------------------------------
def reference_forward(pt_fea_list, xy_ind_list, params, perm_key):
    cat_fea, unq, unq_inv = _prepare(pt_fea_list, xy_ind_list, perm_key)
    x = np.asarray(cat_fea, np.float64)
    p = {k: np.asarray(v, np.float64) for k, v in params.items()}

    def bn(h, g, b):
        mean = h.mean(0, keepdims=True)
        var = ((h - mean) ** 2).mean(0, keepdims=True)
        return (h - mean) / np.sqrt(var + EPS) * g + b

    h = bn(x, p["bn0_w"], p["bn0_b"])
    h = h @ p["lin1_w"] + p["lin1_b"]
    h = np.maximum(bn(h, p["bn1_w"], p["bn1_b"]), 0.0)
    h = h @ p["lin2_w"] + p["lin2_b"]
    h = np.maximum(bn(h, p["bn2_w"], p["bn2_b"]), 0.0)
    h = h @ p["lin3_w"] + p["lin3_b"]
    h = np.maximum(bn(h, p["bn3_w"], p["bn3_b"]), 0.0)
    h = h @ p["lin4_w"] + p["lin4_b"]

    m = unq.shape[0]
    pooled = np.full((m, OUT_PT_FEA_DIM), -np.inf)
    np.maximum.at(pooled, unq_inv, h)
    return unq, pooled


if __name__ == "__main__":
    key = jax.random.PRNGKey(0)
    k_fea, k_ind, k_perm, k_param = jax.random.split(key, 4)

    # batch of 2 point clouds, 9 features/point, voxel indices in a small 3x3x3
    # grid so many points share a voxel (exercises both scatter paths, multiple
    # N tiles, padded rows and the dump-row path).
    npts = [300, 221]
    pt_fea = [jax.random.normal(jax.random.fold_in(k_fea, i), (n, FEA_DIM), jnp.float32)
              for i, n in enumerate(npts)]
    xy_ind = [jax.random.randint(jax.random.fold_in(k_ind, i), (n, 3), 0, 3, jnp.int32)
              for i, n in enumerate(npts)]

    params = init_params(k_param)

    unq, pooled = cylinder_fea_forward(pt_fea, xy_ind, params, k_perm, grid_size=(8, 8, 4))
    pooled = jax.block_until_ready(pooled)

    unq_ref, pooled_ref = reference_forward(pt_fea, xy_ind, params, k_perm)

    assert unq.shape == unq_ref.shape and np.array_equal(unq, unq_ref)
    assert pooled.shape == (unq.shape[0], OUT_PT_FEA_DIM)
    # tolerance reflects intentional bf16 MXU matmul inputs (f32 accumulation)
    np.testing.assert_allclose(np.asarray(pooled), pooled_ref, rtol=3e-2, atol=3e-2)
    print("KERNEL_OK")
</pallas_src>

<mosaic_0001>
module attributes {stable_mosaic.version = 11 : i64} {
  func.func @stats_kernel(%arg0: i32, %arg1: memref<1xi32, #tpu.memory_space<smem>>, %arg2: memref<512x16xf32, #tpu.memory_space<vmem>>, %arg3: memref<2x16xf32, #tpu.memory_space<vmem>>) attributes {dimension_semantics = [#tpu.dimension_semantics<arbitrary>], iteration_bounds = array<i64: 2>, scalar_prefetch = 1 : i64, scratch_operands = 0 : i64, tpu.core_type = #tpu.core_type<tc>, window_params = [{transform_indices = @transform_0, window_bounds = array<i64: 512, 16>}, {pipeline_mode = #tpu.pipeline_mode<synchronous>, transform_indices = @transform_1, window_bounds = array<i64: 2, 16>}]} {
    %c0_i32 = arith.constant 0 : i32
    %0 = arith.cmpi eq, %arg0, %c0_i32 : i32
    %1 = arith.extui %0 : i1 to i32
    %c0_i32_0 = arith.constant 0 : i32
    %2 = arith.cmpi ne, %1, %c0_i32_0 : i32
    scf.if %2 {
      %cst_9 = arith.constant 0.000000e+00 : f32
      %24 = vector.broadcast %cst_9 : f32 to vector<2x16xf32>
      %c0_10 = arith.constant 0 : index
      %c0_11 = arith.constant 0 : index
      %25 = vector.load %arg3[%c0_10, %c0_11] : memref<2x16xf32, #tpu.memory_space<vmem>>, vector<2x16xf32>
      tpu.vector_store %arg3[%c0_10, %c0_11], %24 {strides = array<i32>} : memref<2x16xf32, #tpu.memory_space<vmem>>, vector<2x16xf32>,
    } else {
    }
    %3 = tpu.iota {dimensions = array<i32: 0>} : vector<512x1xi32>
    %c512_i32 = arith.constant 512 : i32
    %4 = arith.muli %arg0, %c512_i32 : i32
    %5 = vector.broadcast %4 : i32 to vector<512x1xi32>
    %6 = arith.addi %3, %5 : vector<512x1xi32>
    %c0 = arith.constant 0 : index
    %7 = memref.load %arg1[%c0] : memref<1xi32, #tpu.memory_space<smem>>
    %8 = vector.broadcast %7 : i32 to vector<512x1xi32>
    %9 = arith.cmpi slt, %6, %8 : vector<512x1xi32>
    %c0_1 = arith.constant 0 : index
    %c0_2 = arith.constant 0 : index
    %10 = vector.load %arg2[%c0_1, %c0_2] : memref<512x16xf32, #tpu.memory_space<vmem>>, vector<512x16xf32>
    %cst = arith.constant 0.000000e+00 : f32
    %11 = vector.shape_cast %9 : vector<512x1xi1> to vector<512x1xi1>
    %12 = vector.broadcast %11 : vector<512x1xi1> to vector<512x16xi1>
    %13 = vector.broadcast %cst : f32 to vector<512x16xf32>
    %14 = arith.select %12, %10, %13 : vector<512x16xi1>, vector<512x16xf32>
    %cst_3 = arith.constant dense<0.000000e+00> : vector<16xf32>
    %15 = vector.multi_reduction <add>, %14, %cst_3 [0] : vector<512x16xf32> to vector<16xf32>
    %16 = vector.shape_cast %15 : vector<16xf32> to vector<1x16xf32>
    %17 = arith.mulf %14, %14 : vector<512x16xf32>
    %cst_4 = arith.constant dense<0.000000e+00> : vector<16xf32>
    %18 = vector.multi_reduction <add>, %17, %cst_4 [0] : vector<512x16xf32> to vector<16xf32>
    %19 = vector.shape_cast %18 : vector<16xf32> to vector<1x16xf32>
    %20 = tpu.concatenate %16, %19 in 0 : vector<1x16xf32>, vector<1x16xf32> -> vector<2x16xf32>
    %c0_5 = arith.constant 0 : index
    %c0_6 = arith.constant 0 : index
    %21 = vector.load %arg3[%c0_5, %c0_6] : memref<2x16xf32, #tpu.memory_space<vmem>>, vector<2x16xf32>
    %22 = arith.addf %21, %20 : vector<2x16xf32>
    %c0_7 = arith.constant 0 : index
    %c0_8 = arith.constant 0 : index
    %23 = vector.load %arg3[%c0_7, %c0_8] : memref<2x16xf32, #tpu.memory_space<vmem>>, vector<2x16xf32>
    tpu.vector_store %arg3[%c0_7, %c0_8], %22 {strides = array<i32>} : memref<2x16xf32, #tpu.memory_space<vmem>>, vector<2x16xf32>,
    return
  }
  func.func @transform_0(%arg0: i32, %arg1: memref<1xi32, #tpu.memory_space<smem>>) -> (i32, i32) {
    %c0_i32 = arith.constant 0 : i32
    %c0_i32_0 = arith.constant 0 : i32
    return %arg0, %c0_i32 : i32, i32
  }
  func.func @transform_1(%arg0: i32, %arg1: memref<1xi32, #tpu.memory_space<smem>>) -> (i32, i32) {
    %c0_i32 = arith.constant 0 : i32
    %c0_i32_0 = arith.constant 0 : i32
    %c0_i32_1 = arith.constant 0 : i32
    return %c0_i32, %c0_i32_0 : i32, i32
  }
}

</mosaic_0001>

<bundles_post_ra>
// kernel: tpu_custom_call.1
= control target key start
LH: loop header
LB: loop body
LE: loop exit
PB: predicated region body
PF: predicated region fallthrough
CT: control target
= control target key end

     0   :  { %s2481_s0 = inlined_call_operand.<no memory space> [shape: s32[1], index: 0, kind: input, shape index: {}]   ;;  %s2482_s1 = inlined_call_operand.vmem [shape: f32[1024,16], index: 1, kind: input, shape index: {}]   ;;  %s2483_s2 = inlined_call_operand.hbm [shape: f32[2,16], index: 2, kind: output, shape index: {}]  }
   0x1   :  { %7 = sst [smem:[#allocation3]] %s2481_s0 }
   0x2   :  { %8 = vsyncpa [#allocation5], 0  ;;  %s1033_s11 = smov 0  }
   0x3 LB: > { %s1039_s12 = sadd.s32 4294967295, %s1011_s11   ;;  %p952_p0 = scmp.ge.s32.totalorder %s1011_s11, 1  ;;  %s1011_s11 = sphi %s1033_s11, %s14_s11  }
   0x4   : > { %p86_p1 = scmp.lt.s32.totalorder %s1011_s11, 3 }
   0x6   : > { %p87_p2 = pnand %p952_p0, %p86_p1 }
   0x8   : > { %90 = sbr.rel (%p87_p2) target bundleno = 306 (0x132), region = 24 }
   0xd   : > { %s953_s13 = sshll.u32 %s1039_s12, 6  ;;  %p955_p4 = scmp.ne.s32.totalorder %s1039_s12, 0 }
   0xe   : > { %p102_p3 = scmp.lt.s32.totalorder %s953_s13, 127 }
   0xf   : > { %110 = sbr.rel (%p955_p4) target bundleno = 22 (0x16), region = 28 }
  0x10   : > { %s2908_s13 = smov (!%p102_p3, %s953_s13), 127 }
  0x11   : > { %s954_s0 = sshll.u32 %s2908_s13, 3 }
  0x12   : > { %s1047_s16 = scalar_lea.vmem %s2482_s1, %s954_s0 }
  0x14   : > { %vm111_vm0 = vcmask 123904   ;;  %v1013_v0 = vmov 0.0  }
  0x15   : > { %112 = vst.msk [vmem:[#allocation4] sm:$0x3] %vm111_vm0, %v1013_v0 }
  0x16 PF: > { %v113_v1 = vlaneseq  ;;  %s956_s17 = sshll.u32 %s1039_s12, 9  ;;  %s1197_s18 = sld [smem:[#allocation3]] }
  0x17   : > { %v1053_v3 = vstv %s956_s17  ;;  %s1014_s19 = smov [#allocation4]   ;;  %p965_p5 = scmp.eq.s32.totalorder %s1039_s12, 1 }
  0x18   : > { %v1050_v2 = vshrl.u32 %v113_v1, 7  ;;  %s910_s20 = sshll.u32 %s1014_s19, 4  ;;  %s911_s20 = int_to_ptr.vmem [resolvable:$true] %s910_s20 }
  0x19   : > { %s977_s21 = scalar_lea.vmem %s911_s20, 32  ;;  %p984_p9 = scmp.lt.s32.totalorder %s911_s20, %s911_s20 }
  0x1a   : > { %v1056_v4 = vadd.s32 8, %v1050_v2  ;;  %v1059_v5 = vadd.s32 16, %v1050_v2  ;;  %v1062_v6 = vadd.s32 24, %v1050_v2  ;;  %v1065_v7 = vadd.s32 32, %v1050_v2  ;;  %p978_p6 = scmp.ne.s32.totalorder %s911_s20, %s977_s21  ;;  %p985_p10 = scmp.lt.s32.totalorder %s977_s21, %s977_s21 }
  0x1b   : > { %v1068_v8 = vadd.s32 40, %v1050_v2  ;;  %v147_v9 = vadd.s32 264, %v1050_v2  ;;  %v148_v10 = vadd.s32 272, %v1050_v2  ;;  %v149_v11 = vadd.s32 280, %v1050_v2 }
  0x1c   : > { %v150_v12 = vadd.s32 288, %v1050_v2  ;;  %v151_v13 = vadd.s32 296, %v1050_v2  ;;  %v152_v14 = vadd.s32 304, %v1050_v2  ;;  %v153_v15 = vadd.s32 312, %v1050_v2  ;;  %p979_p7 = pnand %p978_p6, %p965_p5  ;;  %p986_p11 = por %p985_p10, %p984_p9 }
  0x1d   : > { %v154_v16 = vadd.s32 320, %v1050_v2  ;;  %v155_v17 = vadd.s32 328, %v1050_v2  ;;  %v156_v18 = vadd.s32 336, %v1050_v2  ;;  %v157_v19 = vadd.s32 344, %v1050_v2 }
  0x1e   : > { %v158_v20 = vadd.s32 352, %v1050_v2  ;;  %v159_v21 = vadd.s32 360, %v1050_v2  ;;  %v160_v22 = vadd.s32 368, %v1050_v2  ;;  %v161_v23 = vadd.s32 376, %v1050_v2  ;;  %p980_p8 = pneg %p979_p7 }
  0x1f   : > { %v162_v24 = vadd.s32 384, %v1050_v2  ;;  %v163_v25 = vadd.s32 392, %v1050_v2  ;;  %v164_v26 = vadd.s32 400, %v1050_v2  ;;  %v165_v27 = vadd.s32 408, %v1050_v2 }
  0x20   : > { %v166_v28 = vadd.s32 416, %v1050_v2  ;;  %v167_v29 = vadd.s32 424, %v1050_v2  ;;  %v168_v30 = vadd.s32 432, %v1050_v2  ;;  %v169_v31 = vadd.s32 440, %v1050_v2  ;;  %p987_p12 = pnand %p986_p11, %p980_p8 }
  0x21   : > { %v170_v32 = vadd.s32 448, %v1050_v2  ;;  %v171_v33 = vadd.s32 456, %v1050_v2  ;;  %v172_v34 = vadd.s32 464, %v1050_v2  ;;  %v173_v35 = vadd.s32 472, %v1050_v2 }
  0x22   : > { %v174_v36 = vadd.s32 480, %v1050_v2  ;;  %v175_v37 = vadd.s32 488, %v1050_v2  ;;  %v176_v38 = vadd.s32 496, %v1050_v2  ;;  %v177_v39 = vadd.s32 504, %v1050_v2 }
  0x23   : > { %v1102_v40 = vadd.s32 %v1053_v3, %v147_v9  ;;  %v1105_v41 = vadd.s32 %v1053_v3, %v148_v10  ;;  %v1108_v42 = vadd.s32 %v1053_v3, %v149_v11  ;;  %v1111_v43 = vadd.s32 %v1053_v3, %v150_v12 }
  0x24   : > { %v1114_v44 = vadd.s32 %v1053_v3, %v151_v13  ;;  %v1117_v45 = vadd.s32 %v1053_v3, %v152_v14  ;;  %v1120_v46 = vadd.s32 %v1053_v3, %v153_v15  ;;  %v1123_v47 = vadd.s32 %v1053_v3, %v154_v16 }
  0x25   : > { %v1126_v48 = vadd.s32 %v1053_v3, %v155_v17  ;;  %v1129_v49 = vadd.s32 %v1053_v3, %v156_v18  ;;  %v1132_v50 = vadd.s32 %v1053_v3, %v157_v19  ;;  %v1135_v51 = vadd.s32 %v1053_v3, %v158_v20 }
  0x26   : > { %v1138_v52 = vadd.s32 %v1053_v3, %v159_v21  ;;  %v1141_v53 = vadd.s32 %v1053_v3, %v160_v22  ;;  %v1144_v54 = vadd.s32 %v1053_v3, %v161_v23  ;;  %v1147_v55 = vadd.s32 %v1053_v3, %v162_v24 }
  0x27   : > { %v1150_v56 = vadd.s32 %v1053_v3, %v163_v25  ;;  %v1153_v57 = vadd.s32 %v1053_v3, %v164_v26  ;;  %v1156_v58 = vadd.s32 %v1053_v3, %v165_v27  ;;  %v1159_v59 = vadd.s32 %v1053_v3, %v166_v28 }
  0x28   : > { %v1162_v60 = vadd.s32 %v1053_v3, %v167_v29  ;;  %v1165_v61 = vadd.s32 %v1053_v3, %v168_v30  ;;  %v1168_v62 = vadd.s32 %v1053_v3, %v169_v31  ;;  %v1171_v63 = vadd.s32 %v1053_v3, %v170_v32 }
  0x29   : > { %v1174_v0 = vadd.s32 %v1053_v3, %v171_v33  ;;  %v1177_v1 = vadd.s32 %v1053_v3, %v172_v34  ;;  %v1180_v9 = vadd.s32 %v1053_v3, %v173_v35  ;;  %v1183_v10 = vadd.s32 %v1053_v3, %v174_v36 }
  0x2a   : > { %2549 = vst [vmem:[#allocation7_spill] sm:$0xff] %v1168_v62  ;;  %2550 = vst [vmem:[#allocation8_spill] sm:$0xff] %v1171_v63  ;;  %v1186_v11 = vadd.s32 48, %v1050_v2  ;;  %v1189_v12 = vadd.s32 %v1053_v3, %v175_v37  ;;  %v1192_v13 = vadd.s32 %v1053_v3, %v176_v38  ;;  %v1195_v14 = vadd.s32 %v1053_v3, %v177_v39  ;;  %v351_v63 = vld [vmem:[%s1047_s16 + $0x148] sm:$0xff]  ;;  %v352_v62 = vld [vmem:[%s1047_s16 + $0x150] sm:$0xff] }
  0x2b   : > { %2551 = vst [vmem:[#allocation9_spill] sm:$0xff] %v1174_v0  ;;  %2552 = vst [vmem:[#allocation10_spill] sm:$0xff] %v1177_v1  ;;  %v1200_v15 = vadd.s32 56, %v1050_v2  ;;  %v1203_v16 = vadd.s32 64, %v1050_v2  ;;  %v1206_v17 = vadd.s32 72, %v1050_v2  ;;  %v1209_v18 = vadd.s32 80, %v1050_v2 }
  0x2c   : > { %2553 = vst [vmem:[#allocation11_spill] sm:$0xff] %v1180_v9  ;;  %2554 = vst [vmem:[#allocation12_spill] sm:$0xff] %v1183_v10  ;;  %v1212_v19 = vadd.s32 88, %v1050_v2  ;;  %v1215_v20 = vadd.s32 96, %v1050_v2  ;;  %v1218_v21 = vadd.s32 104, %v1050_v2  ;;  %v1221_v22 = vadd.s32 112, %v1050_v2 }
  0x2d   : > { %2555 = vst [vmem:[#allocation13_spill] sm:$0xff] %v1189_v12  ;;  %2556 = vst [vmem:[#allocation14_spill] sm:$0xff] %v1192_v13  ;;  %v1224_v23 = vadd.s32 120, %v1050_v2  ;;  %v1227_v24 = vadd.s32 128, %v1050_v2  ;;  %v1230_v25 = vadd.s32 136, %v1050_v2  ;;  %v1233_v26 = vadd.s32 144, %v1050_v2 }
  0x2e   : > { %2557 = vst [vmem:[#allocation15_spill] sm:$0xff] %v1195_v14  ;;  %v1236_v27 = vadd.s32 152, %v1050_v2  ;;  %v1239_v28 = vadd.s32 160, %v1050_v2  ;;  %v1242_v29 = vadd.s32 168, %v1050_v2  ;;  %v1245_v30 = vadd.s32 176, %v1050_v2  ;;  %v345_v14 = vld [vmem:[%s1047_s16 + $0x118] sm:$0xff] }
  0x2f   : > { %v1248_v31 = vadd.s32 184, %v1050_v2  ;;  %v1251_v32 = vadd.s32 192, %v1050_v2  ;;  %v1254_v33 = vadd.s32 200, %v1050_v2  ;;  %v1257_v34 = vadd.s32 208, %v1050_v2  ;;  %v346_v13 = vld [vmem:[%s1047_s16 + $0x120] sm:$0xff]  ;;  %v347_v12 = vld [vmem:[%s1047_s16 + $0x128] sm:$0xff] }
  0x30   : > { %v1260_v35 = vadd.s32 216, %v1050_v2  ;;  %v1263_v36 = vadd.s32 224, %v1050_v2  ;;  %v1266_v37 = vadd.s32 232, %v1050_v2  ;;  %v1269_v38 = vadd.s32 240, %v1050_v2  ;;  %v350_v10 = vld [vmem:[%s1047_s16 + $0x140] sm:$0xff] }
  0x31   : > { %2558 = vst [vmem:[#allocation16_spill] sm:$0xff] %v1254_v33  ;;  %2559 = vst [vmem:[#allocation17_spill] sm:$0xff] %v1257_v34  ;;  %v1272_v39 = vadd.s32 248, %v1050_v2  ;;  %v1275_v33 = vadd.s32 256, %v1050_v2  ;;  %v1279_v34 = vadd.s32 %v1053_v3, %v1050_v2  ;;  %v1302_v2 = vadd.s32 %v1053_v3, %v1068_v8 }
  0x32   : > { %2560 = vst [vmem:[#allocation18_spill] sm:$0xff] %v1260_v35  ;;  %2561 = vst [vmem:[#allocation19_spill] sm:$0xff] %v1266_v37  ;;  %v1283_v35 = vadd.s32 %v1053_v3, %v1056_v4  ;;  %v1287_v37 = vadd.s32 %v1053_v3, %v1059_v5  ;;  %v1368_v4 = vadd.s32 %v1053_v3, %v1186_v11 }
  0x33   : > { %2562 = vst [vmem:[#allocation20_spill] sm:$0xff] %v1269_v38  ;;  %2563 = vst [vmem:[#allocation21_spill] sm:$0xff] %v1272_v39  ;;  %v1291_v38 = vadd.s32 %v1053_v3, %v1062_v6  ;;  %v1295_v39 = vadd.s32 %v1053_v3, %v1065_v7  ;;  %v1372_v5 = vadd.s32 %v1053_v3, %v1200_v15 }
  0x34   : > { %2564 = vst [vmem:[#allocation22_spill] sm:$0xff] %v1275_v33  ;;  %v1298_v33 = vstv %s1197_s18  ;;  %v1376_v6 = vadd.s32 %v1053_v3, %v1203_v16  ;;  %v1380_v7 = vadd.s32 %v1053_v3, %v1206_v17  ;;  %v1384_v8 = vadd.s32 %v1053_v3, %v1209_v18 }
  0x35   : > { %vm279_vm1 = vcmp.lt.s32.totalorder %v1102_v40, %v1298_v33  ;;  %vm280_vm2 = vcmp.lt.s32.totalorder %v1105_v41, %v1298_v33  ;;  %v1388_v11 = vadd.s32 %v1053_v3, %v1212_v19  ;;  %v1392_v15 = vadd.s32 %v1053_v3, %v1215_v20  ;;  %v360_v41 = vld [vmem:[%s1047_s16 + $0x190] sm:$0xff] }
  0x36   : > { %v1396_v16 = vadd.s32 %v1053_v3, %v1218_v21  ;;  %v1400_v17 = vadd.s32 %v1053_v3, %v1221_v22  ;;  %v1404_v18 = vadd.s32 %v1053_v3, %v1224_v23  ;;  %v1408_v19 = vadd.s32 %v1053_v3, %v1227_v24 }
  0x37   : > { %v1412_v20 = vadd.s32 %v1053_v3, %v1230_v25  ;;  %v1416_v21 = vadd.s32 %v1053_v3, %v1233_v26  ;;  %v1420_v22 = vadd.s32 %v1053_v3, %v1236_v27  ;;  %v1424_v23 = vadd.s32 %v1053_v3, %v1239_v28 }
  0x38   : > { %2565 = vst [vmem:[#allocation23_spill] sm:$0xff] %v1400_v17  ;;  %2566 = vst [vmem:[#allocation24_spill] sm:$0xff] %v1404_v18  ;;  %v1428_v24 = vadd.s32 %v1053_v3, %v1242_v29  ;;  %v1432_v25 = vadd.s32 %v1053_v3, %v1245_v30  ;;  %v1436_v26 = vadd.s32 %v1053_v3, %v1248_v31  ;;  %v2576_v28 = vld [vmem:[#allocation16_spill] sm:$0xff]  ;;  %v2578_v29 = vld [vmem:[#allocation17_spill] sm:$0xff] }
  0x39   : > { %2567 = vst [vmem:[#allocation25_spill] sm:$0xff] %v1408_v19  ;;  %2568 = vst [vmem:[#allocation26_spill] sm:$0xff] %v1412_v20  ;;  %v1440_v27 = vadd.s32 %v1053_v3, %v1251_v32  ;;  %v1448_v30 = vadd.s32 %v1053_v3, %v2578_v29  ;;  %v1456_v31 = vadd.s32 %v1053_v3, %v1263_v36  ;;  %v2583_v32 = vld [vmem:[#allocation19_spill] sm:$0xff]  ;;  %v344_v19 = vld [vmem:[%s1047_s16 + $0x110] sm:$0xff] }
  0x3a   : > { %2569 = vst [vmem:[#allocation27_spill] sm:$0xff] %v1416_v21  ;;  %2570 = vst [vmem:[#allocation28_spill] sm:$0xff] %v1420_v22  ;;  %v2585_v29 = vld [vmem:[#allocation20_spill] sm:$0xff]  ;;  %vm246_vm0 = vcmp.lt.s32.totalorder %v1279_v34, %v1298_v33  ;;  %vm247_vm15 = vcmp.lt.s32.totalorder %v1283_v35, %v1298_v33  ;;  %vm248_vm14 = vcmp.lt.s32.totalorder %v1287_v37, %v1298_v33  ;;  %v349_v17 = vld [vmem:[%s1047_s16 + $0x138] sm:$0xff] }
  0x3b   : > { %2571 = vst [vmem:[#allocation29_spill] sm:$0xff] %v1424_v23  ;;  %2572 = vst [vmem:[#allocation30_spill] sm:$0xff] %v1428_v24  ;;  %v1444_v23 = vadd.s32 %v1053_v3, %v2576_v28  ;;  %v311_v28 = vld [vmem:[%s1047_s16 + $0x8] sm:$0xff]  ;;  %v316_v21 = vld [vmem:[%s1047_s16 + $0x30] sm:$0xff]  ;;  %vm249_vm13 = vcmp.lt.s32.totalorder %v1291_v38, %v1298_v33  ;;  %vm250_vm12 = vcmp.lt.s32.totalorder %v1295_v39, %v1298_v33 }
  0x3c   : > { %2573 = vst [vmem:[#allocation31_spill] sm:$0xff] %v1432_v25  ;;  %2574 = vst [vmem:[#allocation32_spill] sm:$0xff] %v1436_v26  ;;  %v2580_v25 = vld [vmem:[#allocation18_spill] sm:$0xff]  ;;  %v315_v22 = vld [vmem:[%s1047_s16 + $0x28] sm:$0xff]  ;;  %vm251_vm11 = vcmp.lt.s32.totalorder %v1302_v2, %v1298_v33  ;;  %vm252_vm10 = vcmp.lt.s32.totalorder %v1368_v4, %v1298_v33  ;;  %vm253_vm9 = vcmp.lt.s32.totalorder %v1372_v5, %v1298_v33  ;;  %v1532_v1 = vsel %vm247_vm15, %v311_v28, 0.0 }
  0x3d   : > { %2575 = vst [vmem:[#allocation33_spill] sm:$0xff] %v1440_v27  ;;  %2577 = vst [vmem:[#allocation16_spill] sm:$0xff] %v1444_v23  ;;  %v1452_v24 = vadd.s32 %v1053_v3, %v2580_v25  ;;  %v1460_v27 = vadd.s32 %v1053_v3, %v2583_v32  ;;  %v310_v26 = vld [vmem:[%s1047_s16] sm:$0xff]  ;;  %v312_v23 = vld [vmem:[%s1047_s16 + $0x10] sm:$0xff]  ;;  %v1467_v25 = vadd.s32 %v1053_v3, %v2585_v29  ;;  %v1554_v37 = vsel %vm251_vm11, %v315_v22, 0.0 }
  0x3e   : > { %2579 = vst [vmem:[#allocation17_spill] sm:$0xff] %v1448_v30  ;;  %2582 = vst [vmem:[#allocation34_spill] sm:$0xff] %v1456_v31  ;;  %v2589_v31 = vld [vmem:[#allocation22_spill] sm:$0xff]  ;;  %v320_v29 = vld [vmem:[%s1047_s16 + $0x50] sm:$0xff]  ;;  %vm254_vm8 = vcmp.lt.s32.totalorder %v1376_v6, %v1298_v33  ;;  %vm255_vm7 = vcmp.lt.s32.totalorder %v1380_v7, %v1298_v33  ;;  %vm256_vm6 = vcmp.lt.s32.totalorder %v1384_v8, %v1298_v33  ;;  %v1527_v9 = vsel %vm246_vm0, %v310_v26, 0.0 }
  0x3f   : > { %2581 = vst [vmem:[#allocation18_spill] sm:$0xff] %v1452_v24  ;;  %2584 = vst [vmem:[#allocation19_spill] sm:$0xff] %v1460_v27  ;;  %v2587_v24 = vld [vmem:[#allocation21_spill] sm:$0xff]  ;;  %v1475_v32 = vadd.s32 %v1053_v3, %v2589_v31  ;;  %v314_v30 = vld [vmem:[%s1047_s16 + $0x20] sm:$0xff]  ;;  %vm257_vm5 = vcmp.lt.s32.totalorder %v1388_v11, %v1298_v33  ;;  %vm258_vm4 = vcmp.lt.s32.totalorder %v1392_v15, %v1298_v33  ;;  %v1537_v0 = vsel %vm248_vm14, %v312_v23, 0.0 }
  0x40   : > { %2586 = vst [vmem:[#allocation20_spill] sm:$0xff] %v1467_v25  ;;  %v1471_v36 = vadd.s32 %v1053_v3, %v2587_v24  ;;  %v313_v27 = vld [vmem:[%s1047_s16 + $0x18] sm:$0xff]  ;;  %v318_v24 = vld [vmem:[%s1047_s16 + $0x40] sm:$0xff]  ;;  %v319_v31 = vld [vmem:[%s1047_s16 + $0x48] sm:$0xff]  ;;  %vm259_vm3 = vcmp.lt.s32.totalorder %v1396_v16, %v1298_v33  ;;  %v1549_v35 = vsel %vm250_vm12, %v314_v30, 0.0  ;;  %v1559_v23 = vsel %vm252_vm10, %v316_v21, 0.0 }
  0x41   : > { %2590 = vst [vmem:[#allocation22_spill] sm:$0xff] %v1475_v32  ;;  %v317_v3 = vld [vmem:[%s1047_s16 + $0x38] sm:$0xff]  ;;  %v323_v25 = vld [vmem:[%s1047_s16 + $0x68] sm:$0xff]  ;;  %v348_v18 = vld [vmem:[%s1047_s16 + $0x130] sm:$0xff]  ;;  %v1544_v34 = vsel %vm249_vm13, %v313_v27, 0.0  ;;  %v1572_v2 = vsel %vm254_vm8, %v318_v24, 0.0  ;;  %vm2608_vm8 = vcmp.lt.s32.totalorder %v1129_v49, %v1298_v33  ;;  %vm2612_vm12 = vcmp.lt.s32.totalorder %v1132_v50, %v1298_v33 }
  0x42   : > { %2588 = vst [vmem:[#allocation21_spill] sm:$0xff] %v1471_v36  ;;  %v321_v32 = vld [vmem:[%s1047_s16 + $0x58] sm:$0xff]  ;;  %v322_v36 = vld [vmem:[%s1047_s16 + $0x60] sm:$0xff]  ;;  %v343_v20 = vld [vmem:[%s1047_s16 + $0x108] sm:$0xff]  ;;  %v1567_v39 = vsel %vm253_vm9, %v317_v3, 0.0  ;;  %v1577_v4 = vsel %vm255_vm7, %v319_v31, 0.0  ;;  %vm2606_vm7 = vcmp.lt.s32.totalorder %v1126_v48, %v1298_v33  ;;  %vm2613_vm13 = vcmp.lt.s32.totalorder %v1135_v51, %v1298_v33 }
  0x43   : > { %v353_v38 = vld [vmem:[%s1047_s16 + $0x158] sm:$0xff]  ;;  %v354_v26 = vld [vmem:[%s1047_s16 + $0x160] sm:$0xff]  ;;  %v355_v27 = vld [vmem:[%s1047_s16 + $0x168] sm:$0xff]  ;;  %2591 = vst [vmem:[#allocation35_spill] sm:$0xff] %v1572_v2  ;;  %v1582_v21 = vsel %vm256_vm6, %v320_v29, 0.0  ;;  %v1589_v6 = vsel %vm257_vm5, %v321_v32, 0.0  ;;  %vm2603_vm5 = vcmp.lt.s32.totalorder %v1120_v46, %v1298_v33  ;;  %vm2604_vm6 = vcmp.lt.s32.totalorder %v1123_v47, %v1298_v33 }
  0x44   : > { %2592 = vst [vmem:[#allocation36_spill] sm:$0xff] %v1577_v4  ;;  %2593 = vst [vmem:[#allocation37_spill] sm:$0xff] %v1582_v21  ;;  %v356_v5 = vld [vmem:[%s1047_s16 + $0x170] sm:$0xff]  ;;  %v357_v22 = vld [vmem:[%s1047_s16 + $0x178] sm:$0xff]  ;;  %v1594_v7 = vsel %vm258_vm4, %v322_v36, 0.0  ;;  %v1599_v8 = vsel %vm259_vm3, %v323_v25, 0.0  ;;  %vm2596_vm4 = vcmp.lt.s32.totalorder %v1108_v42, %v1298_v33  ;;  %vm2598_vm3 = vcmp.lt.s32.totalorder %v1111_v43, %v1298_v33 }
  0x45   : > { %v1604_v30 = vsel %vm279_vm1, %v343_v20, 0.0  ;;  %v358_v11 = vld [vmem:[%s1047_s16 + $0x180] sm:$0xff]  ;;  %v359_v28 = vld [vmem:[%s1047_s16 + $0x188] sm:$0xff]  ;;  %v1611_v15 = vsel %vm280_vm2, %v344_v19, 0.0  ;;  %v1616_v16 = vsel %vm2596_vm4, %v345_v14, 0.0  ;;  %v1621_v40 = vsel %vm2598_vm3, %v346_v13, 0.0 }
  0x46   : > { %2594 = vst [vmem:[#allocation38_spill] sm:$0xff] %v1604_v30  ;;  %2595 = vst [vmem:[#allocation39_spill] sm:$0xff] %v1611_v15  ;;  %vm2599_vm1 = vcmp.lt.s32.totalorder %v1114_v44, %v1298_v33  ;;  %v361_v19 = vld [vmem:[%s1047_s16 + $0x198] sm:$0xff]  ;;  %vm2601_vm2 = vcmp.lt.s32.totalorder %v1117_v45, %v1298_v33  ;;  %v1638_v43 = vsel %vm2603_vm5, %v349_v17, 0.0  ;;  %v1643_v44 = vsel %vm2604_vm6, %v350_v10, 0.0  ;;  %v362_v45 = vld [vmem:[%s1047_s16 + $0x1a0] sm:$0xff] }
  0x47   : > { %2597 = vst [vmem:[#allocation40_spill] sm:$0xff] %v1616_v16  ;;  %v1626_v20 = vsel %vm2599_vm1, %v347_v12, 0.0  ;;  %v1633_v42 = vsel %vm2601_vm2, %v348_v18, 0.0  ;;  %2605 = vst [vmem:[#allocation43_spill] sm:$0xff] %v1643_v44  ;;  %v1648_v12 = vsel %vm2606_vm7, %v351_v63, 0.0  ;;  %v363_v13 = vld [vmem:[%s1047_s16 + $0x1a8] sm:$0xff]  ;;  %vm2615_vm14 = vcmp.lt.s32.totalorder %v1138_v52, %v1298_v33 }
  0x48   : > { %2600 = vst [vmem:[#allocation41_spill] sm:$0xff] %v1626_v20  ;;  %2602 = vst [vmem:[#allocation42_spill] sm:$0xff] %v1633_v42  ;;  %v1655_v46 = vsel %vm2608_vm8, %v352_v62, 0.0  ;;  %vm2609_vm9 = vcmask 130048   ;;  %v364_v63 = vld [vmem:[%s1047_s16 + $0x1b0] sm:$0xff]  ;;  %v365_v10 = vld [vmem:[%s1047_s16 + $0x1b8] sm:$0xff]  ;;  %vm2617_vm15 = vcmp.lt.s32.totalorder %v1141_v53, %v1298_v33  ;;  %vm2618_vm0 = vcmp.lt.s32.totalorder %v1144_v54, %v1298_v33 }
  0x49   : > { %2607 = vst [vmem:[#allocation44_spill] sm:$0xff] %v1648_v12  ;;  %v567_v14 = vsel %vm2609_vm9, %v1527_v9, 0.0  ;;  %vm2610_vm10 = vmmov %vm2609_vm9  ;;  %v366_v17 = vld [vmem:[%s1047_s16 + $0x1c0] sm:$0xff]  ;;  %v1669_v49 = vsel %vm2612_vm12, %v353_v38, 0.0  ;;  %v1674_v62 = vsel %vm2613_vm13, %v354_v26, 0.0  ;;  %v1679_v18 = vsel %vm2615_vm14, %v355_v27, 0.0 }
  0x4a   : > { %v568_v47 = vsel %vm2610_vm10, %v1532_v1, 0.0  ;;  %vm2611_vm11 = vmmov %vm2609_vm9  ;;  %2614 = vst [vmem:[#allocation45_spill] sm:$0xff] %v1674_v62  ;;  %v367_v36 = vld [vmem:[%s1047_s16 + $0x1c8] sm:$0xff]  ;;  %v368_v32 = vld [vmem:[%s1047_s16 + $0x1d0] sm:$0xff]  ;;  %v1686_v50 = vsel %vm2617_vm15, %v356_v5, 0.0  ;;  %v1691_v51 = vsel %vm2618_vm0, %v357_v22, 0.0  ;;  %vm2619_vm4 = vcmp.lt.s32.totalorder %v1147_v55, %v1298_v33 }
  0x4b   : > { %v570_v48 = vsel %vm2611_vm11, %v1537_v0, 0.0  ;;  %2616 = vst [vmem:[#allocation46_spill] sm:$0xff] %v1679_v18  ;;  %v569_v25 = vadd.f32 %v568_v47, %v567_v14  ;;  %v1696_v52 = vsel %vm2619_vm4, %v358_v11, 0.0  ;;  %vm2621_vm3 = vmmov %vm2609_vm9  ;;  %v369_v24 = vld [vmem:[%s1047_s16 + $0x1d8] sm:$0xff]  ;;  %v370_v31 = vld [vmem:[%s1047_s16 + $0x1e0] sm:$0xff]  ;;  %vm2622_vm1 = vcmp.lt.s32.totalorder %v1150_v56, %v1298_v33 }
  0x4c   : > { %2620 = vst [vmem:[#allocation47_spill] sm:$0xff] %v1696_v52  ;;  %v572_v3 = vsel %vm2621_vm3, %v1544_v34, 0.0  ;;  %v371_v29 = vld [vmem:[%s1047_s16 + $0x1e8] sm:$0xff]  ;;  %v1706_v53 = vsel %vm2622_vm1, %v359_v28, 0.0  ;;  %vm2624_vm2 = vcmp.lt.s32.totalorder %v1153_v57, %v1298_v33  ;;  %vm2625_vm5 = vcmp.lt.s32.totalorder %v1156_v58, %v1298_v33  ;;  %v372_v26 = vld [vmem:[%s1047_s16 + $0x1f0] sm:$0xff]  ;;  %v373_v27 = vld [vmem:[%s1047_s16 + $0x1f8] sm:$0xff] }
  0x4d   : > { %2623 = vst [vmem:[#allocation48_spill] sm:$0xff] %v1706_v53  ;;  %v1711_v54 = vsel %vm2624_vm2, %v360_v41, 0.0  ;;  %v1716_v55 = vsel %vm2625_vm5, %v361_v19, 0.0  ;;  %v571_v38 = vadd.f32 %v570_v48, %v569_v25  ;;  %vm2627_vm6 = vcmp.lt.s32.totalorder %v1159_v59, %v1298_v33  ;;  %vm2631_vm9 = vmmov %vm2621_vm3  ;;  %v2632_v22 = vld [vmem:[#allocation7_spill] sm:$0xff]  ;;  %v2635_v59 = vld [vmem:[#allocation8_spill] sm:$0xff] }
  0x4e   : > { %2626 = vst [vmem:[#allocation49_spill] sm:$0xff] %v1716_v55  ;;  %v1723_v5 = vsel %vm2627_vm6, %v362_v45, 0.0  ;;  %vm2629_vm7 = vcmp.lt.s32.totalorder %v1162_v60, %v1298_v33  ;;  %vm2630_vm8 = vcmp.lt.s32.totalorder %v1165_v61, %v1298_v33  ;;  %v574_v58 = vsel %vm2631_vm9, %v1549_v35, 0.0  ;;  %v2638_v60 = vld [vmem:[#allocation9_spill] sm:$0xff]  ;;  %v2640_v19 = vld [vmem:[#allocation10_spill] sm:$0xff]  ;;  %v2645_v47 = vld [vmem:[#allocation12_spill] sm:$0xff] }
  0x4f   : > { %2628 = vst [vmem:[#allocation50_spill] sm:$0xff] %v1723_v5  ;;  %v1728_v56 = vsel %vm2629_vm7, %v363_v13, 0.0  ;;  %v1733_v57 = vsel %vm2630_vm8, %v364_v63, 0.0  ;;  %vm2633_vm10 = vcmp.lt.s32.totalorder %v2632_v22, %v1298_v33  ;;  %vm2636_vm11 = vcmp.lt.s32.totalorder %v2635_v59, %v1298_v33  ;;  %v2642_v13 = vld [vmem:[#allocation11_spill] sm:$0xff]  ;;  %vm2647_vm0 = vmmov %vm2621_vm3  ;;  %v2650_v25 = vld [vmem:[#allocation13_spill] sm:$0xff] }
  0x50   : > { %v1740_v11 = vsel %vm2633_vm10, %v365_v10, 0.0  ;;  %v1745_v28 = vsel %vm2636_vm11, %v366_v17, 0.0  ;;  %vm2639_vm12 = vcmp.lt.s32.totalorder %v2638_v60, %v1298_v33  ;;  %v573_v61 = vadd.f32 %v572_v3, %v571_v38  ;;  %v2648_v10 = vld [vmem:[#allocation23_spill] sm:$0xff]  ;;  %v2649_v17 = vld [vmem:[#allocation24_spill] sm:$0xff]  ;;  %v2659_v22 = vld [vmem:[#allocation25_spill] sm:$0xff] }
  0x51   : > { %2634 = vst [vmem:[#allocation7_spill] sm:$0xff] %v1740_v11  ;;  %2637 = vst [vmem:[#allocation8_spill] sm:$0xff] %v1745_v28  ;;  %v1750_v41 = vsel %vm2639_vm12, %v367_v36, 0.0  ;;  %vm2641_vm13 = vcmp.lt.s32.totalorder %v2640_v19, %v1298_v33  ;;  %vm2643_vm14 = vcmp.lt.s32.totalorder %v2642_v13, %v1298_v33  ;;  %vm2646_vm15 = vcmp.lt.s32.totalorder %v2645_v47, %v1298_v33  ;;  %v2660_v59 = vld [vmem:[#allocation26_spill] sm:$0xff]  ;;  %v2667_v19 = vld [vmem:[#allocation29_spill] sm:$0xff] }
  0x52   : > { %v1755_v45 = vsel %vm2641_vm13, %v368_v32, 0.0  ;;  %v1760_v14 = vsel %vm2643_vm14, %v369_v24, 0.0  ;;  %v1765_v48 = vsel %vm2646_vm15, %v370_v31, 0.0  ;;  %v576_v63 = vsel %vm2647_vm0, %v1554_v37, 0.0  ;;  %v2653_v32 = vld [vmem:[#allocation14_spill] sm:$0xff]  ;;  %v2656_v24 = vld [vmem:[#allocation15_spill] sm:$0xff]  ;;  %vm2662_vm9 = vmmov %vm2647_vm0 }
  0x53   : > { %2644 = vst [vmem:[#allocation9_spill] sm:$0xff] %v1760_v14  ;;  %vm260_vm4 = vcmp.lt.s32.totalorder %v2648_v10, %v1298_v33  ;;  %vm261_vm3 = vcmp.lt.s32.totalorder %v2649_v17, %v1298_v33  ;;  %vm2651_vm1 = vcmp.lt.s32.totalorder %v2650_v25, %v1298_v33  ;;  %vm2654_vm2 = vcmp.lt.s32.totalorder %v2653_v32, %v1298_v33  ;;  %vm2663_vm10 = vmmov %vm2647_vm0  ;;  %v2668_v13 = vld [vmem:[#allocation30_spill] sm:$0xff] }
  0x54   : > { %v1776_v36 = vsel %vm2651_vm1, %v371_v29, 0.0  ;;  %v1781_v3 = vsel %vm2654_vm2, %v372_v26, 0.0  ;;  %vm2657_vm5 = vcmp.lt.s32.totalorder %v2656_v24, %v1298_v33  ;;  %v575_v38 = vadd.f32 %v574_v58, %v573_v61  ;;  %v2661_v29 = vld [vmem:[#allocation27_spill] sm:$0xff]  ;;  %vm2664_vm11 = vmmov %vm2647_vm0  ;;  %v2666_v61 = vld [vmem:[#allocation28_spill] sm:$0xff] }
  0x55   : > { %2652 = vst [vmem:[#allocation10_spill] sm:$0xff] %v1776_v36  ;;  %2655 = vst [vmem:[#allocation11_spill] sm:$0xff] %v1781_v3  ;;  %v1786_v31 = vsel %vm2657_vm5, %v373_v27, 0.0  ;;  %vm262_vm6 = vcmp.lt.s32.totalorder %v2659_v22, %v1298_v33  ;;  %vm263_vm7 = vcmp.lt.s32.totalorder %v2660_v59, %v1298_v33  ;;  %vm264_vm8 = vcmp.lt.s32.totalorder %v2661_v29, %v1298_v33 }
  0x56   : > { %2658 = vst [vmem:[#allocation12_spill] sm:$0xff] %v1786_v31  ;;  %v578_v60 = vsel %vm2662_vm9, %v1559_v23, 0.0  ;;  %v580_v26 = vsel %vm2663_vm10, %v1567_v39, 0.0  ;;  %v582_v27 = vsel %vm2664_vm11, %v1572_v2, 0.0  ;;  %vm2665_vm12 = vmmov %vm2647_vm0  ;;  %vm265_vm13 = vcmp.lt.s32.totalorder %v2666_v61, %v1298_v33  ;;  %v2674_v2 = vld [vmem:[#allocation32_spill] sm:$0xff] }
  0x57   : > { %v584_v58 = vsel %vm2665_vm12, %v1577_v4, 0.0  ;;  %vm266_vm14 = vcmp.lt.s32.totalorder %v2667_v19, %v1298_v33  ;;  %vm267_vm15 = vcmp.lt.s32.totalorder %v2668_v13, %v1298_v33  ;;  %v577_v47 = vadd.f32 %v576_v63, %v575_v38  ;;  %vm2669_vm1 = vmmov %vm2647_vm0  ;;  %v2673_v4 = vld [vmem:[#allocation31_spill] sm:$0xff]  ;;  %v2675_v63 = vld [vmem:[#allocation33_spill] sm:$0xff] }
  0x58   : > { %v1810_v25 = vsel %vm2647_vm0, %v1582_v21, 0.0  ;;  %v1814_v32 = vsel %vm2669_vm1, %v1604_v30, 0.0  ;;  %vm2671_vm2 = vmmov %vm2647_vm0  ;;  %vm268_vm5 = vcmp.lt.s32.totalorder %v2673_v4, %v1298_v33  ;;  %vm269_vm9 = vcmp.lt.s32.totalorder %v2674_v2, %v1298_v33  ;;  %v2683_v30 = vld [vmem:[#allocation16_spill] sm:$0xff]  ;;  %v2684_v21 = vld [vmem:[#allocation17_spill] sm:$0xff] }
  0x59   : > { %2670 = vst [vmem:[#allocation23_spill] sm:$0xff] %v1814_v32  ;;  %v1818_v24 = vsel %vm2671_vm2, %v1611_v15, 0.0  ;;  %vm2676_vm11 = vmmov %vm2647_vm0 }
  0x5a   : > { %2672 = vst [vmem:[#allocation24_spill] sm:$0xff] %v1818_v24  ;;  %v1828_v38 = vsel %vm2676_vm11, %v1616_v16, 0.0  ;;  %vm2678_vm12 = vmmov %vm2647_vm0  ;;  %v1836_v24 = vsel %vm2647_vm0, %v1626_v20, 0.0  ;;  %v579_v16 = vadd.f32 %v578_v60, %v577_v47  ;;  %v2692_v20 = vld [vmem:[#allocation19_spill] sm:$0xff]  ;;  %v2693_v60 = vld [vmem:[#allocation20_spill] sm:$0xff] }
  0x5b   : > { %2677 = vst [vmem:[#allocation13_spill] sm:$0xff] %v1828_v38  ;;  %v1832_v32 = vsel %vm2678_vm12, %v1621_v40, 0.0  ;;  %2680 = vst [vmem:[#allocation15_spill] sm:$0xff] %v1836_v24  ;;  %v2685_v38 = vld [vmem:[#allocation18_spill] sm:$0xff]  ;;  %v1854_v24 = vsel %vm2647_vm0, %v1643_v44, 0.0 }
  0x5c   : > { %2679 = vst [vmem:[#allocation14_spill] sm:$0xff] %v1832_v32  ;;  %vm2681_vm1 = vmmov %vm2647_vm0  ;;  %v581_v44 = vadd.f32 %v580_v26, %v579_v16 }
  0x5d   : > { %v1840_v15 = vsel %vm2681_vm1, %v1633_v42, 0.0  ;;  %vm2686_vm12 = vmmov %vm2647_vm0  ;;  %2688 = vst [vmem:[#allocation27_spill] sm:$0xff] %v1854_v24  ;;  %v2691_v42 = vld [vmem:[#allocation34_spill] sm:$0xff]  ;;  %v1872_v24 = vsel %vm2647_vm0, %v1669_v49, 0.0 }
  0x5e   : > { %2682 = vst [vmem:[#allocation25_spill] sm:$0xff] %v1840_v15  ;;  %v1850_v32 = vsel %vm2686_vm12, %v1638_v43, 0.0  ;;  %vm2689_vm1 = vmmov %vm2647_vm0  ;;  %vm274_vm10 = vcmp.lt.s32.totalorder %v2691_v42, %v1298_v33 }
  0x5f   : > { %2687 = vst [vmem:[#allocation26_spill] sm:$0xff] %v1850_v32  ;;  %v1858_v15 = vsel %vm2689_vm1, %v1648_v12, 0.0  ;;  %vm2694_vm12 = vmmov %vm2647_vm0  ;;  %v2701_v12 = vld [vmem:[#allocation21_spill] sm:$0xff] }
  0x60   : > { %2690 = vst [vmem:[#allocation28_spill] sm:$0xff] %v1858_v15  ;;  %v1868_v47 = vsel %vm2694_vm12, %v1655_v46, 0.0  ;;  %2696 = vst [vmem:[#allocation30_spill] sm:$0xff] %v1872_v24  ;;  %v1890_v24 = vsel %vm2647_vm0, %v1691_v51, 0.0 }
  0x61   : > { %2695 = vst [vmem:[#allocation29_spill] sm:$0xff] %v1868_v47  ;;  %vm2697_vm1 = vmmov %vm2647_vm0 }
  0x62   : > { %v1876_v15 = vsel %vm2697_vm1, %v1674_v62, 0.0  ;;  %vm2699_vm11 = vmmov %vm2647_vm0  ;;  %2704 = vst [vmem:[#allocation16_spill] sm:$0xff] %v1890_v24  ;;  %v1912_v24 = vsel %vm2647_vm0, %v1723_v5, 0.0  ;;  %v330_v5 = vld [vmem:[%s1047_s16 + $0xa0] sm:$0xff] }
  0x63   : > { %2698 = vst [vmem:[#allocation31_spill] sm:$0xff] %v1876_v15  ;;  %v1880_v32 = vsel %vm2699_vm11, %v1679_v18, 0.0  ;;  %vm2702_vm12 = vmmov %vm2647_vm0  ;;  %v324_v18 = vld [vmem:[%s1047_s16 + $0x70] sm:$0xff] }
  0x64   : > { %2700 = vst [vmem:[#allocation32_spill] sm:$0xff] %v1880_v32  ;;  %v1886_v47 = vsel %vm2702_vm12, %v1686_v50, 0.0  ;;  %vm2705_vm1 = vmmov %vm2647_vm0  ;;  %v325_v32 = vld [vmem:[%s1047_s16 + $0x78] sm:$0xff] }
  0x65   : > { %2703 = vst [vmem:[#allocation33_spill] sm:$0xff] %v1886_v47  ;;  %v1894_v15 = vsel %vm2705_vm1, %v1696_v52, 0.0  ;;  %vm2707_vm11 = vmmov %vm2647_vm0  ;;  %v327_v47 = vld [vmem:[%s1047_s16 + $0x88] sm:$0xff]  ;;  %v328_v52 = vld [vmem:[%s1047_s16 + $0x90] sm:$0xff] }
  0x66   : > { %2706 = vst [vmem:[#allocation17_spill] sm:$0xff] %v1894_v15  ;;  %v1900_v62 = vsel %vm2707_vm11, %v1706_v53, 0.0  ;;  %vm2709_vm2 = vmmov %vm2647_vm0  ;;  %v326_v15 = vld [vmem:[%s1047_s16 + $0x80] sm:$0xff]  ;;  %v583_v53 = vadd.f32 %v582_v27, %v581_v44  ;;  %v1937_v44 = vsel %vm2647_vm0, %v1750_v41, 0.0  ;;  %v1991_v10 = vsel %vm263_vm7, %v327_v47, 0.0 }
  0x67   : > { %2708 = vst [vmem:[#allocation18_spill] sm:$0xff] %v1900_v62  ;;  %v1904_v16 = vsel %vm2709_vm2, %v1711_v54, 0.0  ;;  %vm2711_vm12 = vmmov %vm2647_vm0  ;;  %v1996_v17 = vsel %vm264_vm8, %v328_v52, 0.0  ;;  %vm2748_vm7 = vcmp.lt.s32.totalorder %v2684_v21, %v1298_v33  ;;  %vm2750_vm8 = vcmp.lt.s32.totalorder %v2685_v38, %v1298_v33 }
  0x68   : > { %2710 = vst [vmem:[#allocation34_spill] sm:$0xff] %v1904_v16  ;;  %v1908_v26 = vsel %vm2711_vm12, %v1716_v55, 0.0  ;;  %2713 = vst [vmem:[#allocation20_spill] sm:$0xff] %v1912_v24  ;;  %v329_v24 = vld [vmem:[%s1047_s16 + $0x98] sm:$0xff] }
  0x69   : > { %2712 = vst [vmem:[#allocation19_spill] sm:$0xff] %v1908_v26  ;;  %vm2714_vm1 = vmmov %vm2647_vm0  ;;  %v2004_v22 = vsel %vm265_vm13, %v329_v24, 0.0 }
  0x6a   : > { %v1919_v62 = vsel %vm2714_vm1, %v1728_v56, 0.0  ;;  %vm2716_vm2 = vmmov %vm2647_vm0  ;;  %2722 = vst [vmem:[#allocation54_spill] sm:$0xff] %v1937_v44 }
  0x6b   : > { %2715 = vst [vmem:[#allocation21_spill] sm:$0xff] %v1919_v62  ;;  %v1923_v16 = vsel %vm2716_vm2, %v1733_v57, 0.0  ;;  %vm2718_vm11 = vmmov %vm2647_vm0  ;;  %v332_v62 = vld [vmem:[%s1047_s16 + $0xb0] sm:$0xff] }
  0x6c   : > { %2717 = vst [vmem:[#allocation51_spill] sm:$0xff] %v1923_v16  ;;  %v1927_v26 = vsel %vm2718_vm11, %v1740_v11, 0.0  ;;  %vm2720_vm12 = vmmov %vm2647_vm0  ;;  %v333_v11 = vld [vmem:[%s1047_s16 + $0xb8] sm:$0xff]  ;;  %v2022_v29 = vsel %vm268_vm5, %v332_v62, 0.0  ;;  %vm2758_vm5 = vcmp.lt.s32.totalorder %v2701_v12, %v1298_v33 }
  0x6d   : > { %2719 = vst [vmem:[#allocation52_spill] sm:$0xff] %v1927_v26  ;;  %v1933_v55 = vsel %vm2720_vm12, %v1745_v28, 0.0  ;;  %vm2723_vm1 = vmmov %vm2647_vm0  ;;  %v331_v26 = vld [vmem:[%s1047_s16 + $0xa8] sm:$0xff]  ;;  %v585_v28 = vadd.f32 %v584_v58, %v583_v53  ;;  %v1967_v53 = vsel %vm260_vm4, %v324_v18, 0.0  ;;  %v1972_v58 = vsel %vm261_vm3, %v325_v32, 0.0 }
  0x6e   : > { %2721 = vst [vmem:[#allocation53_spill] sm:$0xff] %v1933_v55  ;;  %v1941_v27 = vsel %vm2723_vm1, %v1755_v45, 0.0  ;;  %vm2725_vm2 = vmmov %vm2647_vm0  ;;  %v1986_v18 = vsel %vm262_vm6, %v326_v15, 0.0  ;;  %v2009_v15 = vsel %vm266_vm14, %v330_v5, 0.0  ;;  %v2014_v59 = vsel %vm267_vm15, %v331_v26, 0.0 }
  0x6f   : > { %2724 = vst [vmem:[#allocation55_spill] sm:$0xff] %v1941_v27  ;;  %v1945_v16 = vsel %vm2725_vm2, %v1760_v14, 0.0  ;;  %vm2727_vm11 = vmmov %vm2647_vm0  ;;  %v1960_v27 = vsel %vm2647_vm0, %v1781_v3, 0.0  ;;  %v335_v14 = vld [vmem:[%s1047_s16 + $0xc8] sm:$0xff]  ;;  %v337_v3 = vld [vmem:[%s1047_s16 + $0xd8] sm:$0xff]  ;;  %v587_v32 = vadd.f32 %v1810_v25, %v585_v28  ;;  %v2027_v61 = vsel %vm269_vm9, %v333_v11, 0.0 }
  0x70   : > { %2726 = vst [vmem:[#allocation56_spill] sm:$0xff] %v1945_v16  ;;  %v1952_v55 = vsel %vm2727_vm11, %v1765_v48, 0.0  ;;  %vm2729_vm12 = vmmov %vm2647_vm0  ;;  %v334_v16 = vld [vmem:[%s1047_s16 + $0xc0] sm:$0xff]  ;;  %v341_v28 = vld [vmem:[%s1047_s16 + $0xf8] sm:$0xff]  ;;  %vm2744_vm3 = vcmp.lt.s32.totalorder %v2675_v63, %v1298_v33  ;;  %vm2746_vm6 = vcmp.lt.s32.totalorder %v2683_v30, %v1298_v33  ;;  %v2047_v2 = vsel %vm2750_vm8, %v337_v3, 0.0 }
  0x71   : > { %2728 = vst [vmem:[#allocation57_spill] sm:$0xff] %v1952_v55  ;;  %v1956_v44 = vsel %vm2729_vm12, %v1776_v36, 0.0  ;;  %2731 = vst [vmem:[#allocation59_spill] sm:$0xff] %v1960_v27  ;;  %v336_v27 = vld [vmem:[%s1047_s16 + $0xd0] sm:$0xff]  ;;  %v338_v36 = vld [vmem:[%s1047_s16 + $0xe0] sm:$0xff]  ;;  %v2032_v5 = vsel %vm2744_vm3, %v334_v16, 0.0  ;;  %vm2754_vm14 = vcmp.lt.s32.totalorder %v2692_v20, %v1298_v33  ;;  %vm2756_vm15 = vcmp.lt.s32.totalorder %v2693_v60, %v1298_v33 }
  0x72   : > { %2730 = vst [vmem:[#allocation58_spill] sm:$0xff] %v1956_v44  ;;  %vm2732_vm1 = vmmov %vm2647_vm0  ;;  %v2037_v13 = vsel %vm2746_vm6, %v335_v14, 0.0  ;;  %v2042_v4 = vsel %vm2748_vm7, %v336_v27, 0.0  ;;  %v2054_v11 = vsel %vm274_vm10, %v338_v36, 0.0  ;;  %v2069_v3 = vsel %vm2758_vm5, %v341_v28, 0.0 }
  0x73   : > { %v588_v44 = vsel %vm2732_vm1, %v1589_v6, 0.0  ;;  %vm2733_vm2 = vmmov %vm2647_vm0  ;;  %2735 = vst [vmem:[#allocation61_spill] sm:$0xff] %v1986_v18  ;;  %v602_v25 = vsel %vm2647_vm0, %v1996_v17, 0.0 }
  0x74   : > { %v1978_v55 = vsel %vm2733_vm2, %v1786_v31, 0.0  ;;  %2736 = vst [vmem:[#allocation62_spill] sm:$0xff] %v1991_v10  ;;  %2737 = vst [vmem:[#allocation63_spill] sm:$0xff] %v1996_v17  ;;  %v340_v31 = vld [vmem:[%s1047_s16 + $0xf0] sm:$0xff]  ;;  %v589_v19 = vadd.f32 %v588_v44, %v587_v32 }
  0x75   : > { %2734 = vst [vmem:[#allocation60_spill] sm:$0xff] %v1978_v55  ;;  %v339_v55 = vld [vmem:[%s1047_s16 + $0xe8] sm:$0xff]  ;;  %2738 = vst [vmem:[#allocation64_spill] sm:$0xff] %v2004_v22  ;;  %v2064_v21 = vsel %vm2756_vm15, %v340_v31, 0.0 }
  0x76   : > { %2739 = vst [vmem:[#allocation65_spill] sm:$0xff] %v2009_v15  ;;  %2740 = vst [vmem:[#allocation66_spill] sm:$0xff] %v2014_v59  ;;  %v2059_v30 = vsel %vm2754_vm14, %v339_v55, 0.0 }
  0x77   : > { %vm2741_vm4 = vmmov %vm2647_vm0  ;;  %2742 = vst [vmem:[#allocation67_spill] sm:$0xff] %v2022_v29 }
  0x78   : > { %v590_v52 = vsel %vm2741_vm4, %v1594_v7, 0.0  ;;  %2743 = vst [vmem:[#allocation68_spill] sm:$0xff] %v2027_v61  ;;  %2745 = vst [vmem:[#allocation69_spill] sm:$0xff] %v2032_v5 }
  0x79   : > { %2747 = vst [vmem:[#allocation70_spill] sm:$0xff] %v2037_v13  ;;  %2749 = vst [vmem:[#allocation71_spill] sm:$0xff] %v2042_v4  ;;  %v591_v14 = vadd.f32 %v590_v52, %v589_v19 }
  0x7a   : > { %2751 = vst [vmem:[#allocation72_spill] sm:$0xff] %v2047_v2  ;;  %vm2752_vm13 = vmmov %vm2647_vm0 }
  0x7b   : > { %v592_v62 = vsel %vm2752_vm13, %v1599_v8, 0.0  ;;  %2753 = vst [vmem:[#allocation73_spill] sm:$0xff] %v2054_v11  ;;  %2755 = vst [vmem:[#allocation74_spill] sm:$0xff] %v2059_v30 }
  0x7c   : > { %2757 = vst [vmem:[#allocation75_spill] sm:$0xff] %v2064_v21  ;;  %vm2759_vm9 = vmmov %vm2647_vm0  ;;  %v593_v55 = vadd.f32 %v592_v62, %v591_v14  ;;  %v700_v62 = vmul.f32 %v1527_v9, %v1527_v9  ;;  %v701_v14 = vmul.f32 %v1532_v1, %v1532_v1  ;;  %v707_v9 = vmul.f32 %v1567_v39, %v1567_v39  ;;  %v2775_v1 = vld [vmem:[#allocation35_spill] sm:$0xff] }
  0x7d   : > { %v594_v42 = vsel %vm2759_vm9, %v1967_v53, 0.0  ;;  %vm2760_vm10 = vmmov %vm2647_vm0 }
  0x7e   : > { %v596_v36 = vsel %vm2760_vm10, %v1972_v58, 0.0  ;;  %vm2761_vm11 = vmmov %vm2647_vm0  ;;  %v595_v47 = vadd.f32 %v594_v42, %v593_v55  ;;  %v702_v42 = vmul.f32 %v1537_v0, %v1537_v0  ;;  %v703_v55 = vmul.f32 %v1544_v34, %v1544_v34  ;;  %v2776_v0 = vld [vmem:[#allocation36_spill] sm:$0xff]  ;;  %v2777_v34 = vld [vmem:[#allocation37_spill] sm:$0xff] }
  0x7f   : > { %v598_v20 = vsel %vm2761_vm11, %v1986_v18, 0.0  ;;  %vm2762_vm12 = vmmov %vm2647_vm0 }
  0x80   : > { %v600_v31 = vsel %vm2762_vm12, %v1991_v10, 0.0  ;;  %vm2763_vm1 = vmmov %vm2647_vm0  ;;  %v597_v19 = vadd.f32 %v596_v36, %v595_v47  ;;  %v706_v36 = vmul.f32 %v1559_v23, %v1559_v23  ;;  %v2151_v23 = vmul.f32 %v1599_v8, %v1599_v8 }
  0x81   : > { %v604_v12 = vsel %vm2763_vm1, %v2004_v22, 0.0  ;;  %vm2764_vm2 = vmmov %vm2647_vm0  ;;  %v2790_v22 = vld [vmem:[#allocation46_spill] sm:$0xff] }
  0x82   : > { %v606_v24 = vsel %vm2764_vm2, %v2009_v15, 0.0  ;;  %vm2765_vm4 = vmmov %vm2647_vm0  ;;  %v599_v47 = vadd.f32 %v598_v20, %v597_v19  ;;  %v2155_v20 = vmul.f32 %v1967_v53, %v1967_v53  ;;  %v2779_v19 = vld [vmem:[#allocation38_spill] sm:$0xff] }
  0x83   : > { %v608_v63 = vsel %vm2765_vm4, %v2014_v59, 0.0  ;;  %vm2766_vm3 = vmmov %vm2647_vm0 }
  0x84   : > { %v2089_v38 = vsel %vm2766_vm3, %v2022_v29, 0.0  ;;  %vm2767_vm6 = vmmov %vm2647_vm0  ;;  %v601_v39 = vadd.f32 %v600_v31, %v599_v47  ;;  %2778 = vst [vmem:[#allocation35_spill] sm:$0xff] %v2155_v20  ;;  %v2783_v31 = vld [vmem:[#allocation42_spill] sm:$0xff] }
  0x85   : > { %v2093_v60 = vsel %vm2767_vm6, %v2027_v61, 0.0  ;;  %vm2768_vm7 = vmmov %vm2647_vm0  ;;  %v738_v47 = vmul.f32 %v2783_v31, %v2783_v31  ;;  %v739_v61 = vmul.f32 %v1638_v43, %v1638_v43 }
  0x86   : > { %v2097_v16 = vsel %vm2768_vm7, %v2032_v5, 0.0  ;;  %vm2769_vm8 = vmmov %vm2647_vm0  ;;  %v2782_v5 = vld [vmem:[#allocation41_spill] sm:$0xff]  ;;  %v603_v53 = vadd.f32 %v602_v25, %v601_v39 }
  0x87   : > { %v2101_v26 = vsel %vm2769_vm8, %v2037_v13, 0.0  ;;  %vm2770_vm13 = vmmov %vm2647_vm0  ;;  %v2781_v13 = vld [vmem:[#allocation40_spill] sm:$0xff]  ;;  %v737_v8 = vmul.f32 %v2782_v5, %v2782_v5  ;;  %v2788_v39 = vld [vmem:[#allocation45_spill] sm:$0xff] }
  0x88   : > { %v2105_v44 = vsel %vm2770_vm13, %v2042_v4, 0.0  ;;  %vm2771_vm14 = vmmov %vm2647_vm0  ;;  %v710_v4 = vmul.f32 %v2777_v34, %v2777_v34  ;;  %v605_v25 = vadd.f32 %v604_v12, %v603_v53  ;;  %v744_v43 = vmul.f32 %v2788_v39, %v2788_v39  ;;  %v2792_v53 = vld [vmem:[#allocation48_spill] sm:$0xff] }
  0x89   : > { %v2109_v27 = vsel %vm2771_vm14, %v2047_v2, 0.0  ;;  %vm2772_vm15 = vmmov %vm2647_vm0  ;;  %v709_v2 = vmul.f32 %v2776_v0, %v2776_v0  ;;  %v2780_v0 = vld [vmem:[#allocation39_spill] sm:$0xff] }
  0x8a   : > { %v2113_v32 = vsel %vm2772_vm15, %v2054_v11, 0.0  ;;  %vm2773_vm5 = vmmov %vm2647_vm0  ;;  %v708_v11 = vmul.f32 %v2775_v1, %v2775_v1  ;;  %v733_v1 = vmul.f32 %v2779_v19, %v2779_v19  ;;  %v734_v34 = vmul.f32 %v2780_v0, %v2780_v0  ;;  %v2784_v19 = vld [vmem:[#allocation43_spill] sm:$0xff]  ;;  %v2785_v0 = vld [vmem:[#allocation44_spill] sm:$0xff] }
  0x8b   : > { %v2117_v52 = vsel %vm2773_vm5, %v2059_v30, 0.0  ;;  %vm2774_vm9 = vmmov %vm2647_vm0  ;;  %v704_v30 = vmul.f32 %v1549_v35, %v1549_v35  ;;  %v711_v35 = vmul.f32 %v1589_v6, %v1589_v6  ;;  %v735_v6 = vmul.f32 %v2781_v13, %v2781_v13 }
  0x8c   : > { %v2121_v28 = vsel %vm2774_vm9, %v2064_v21, 0.0  ;;  %v705_v21 = vmul.f32 %v1554_v37, %v1554_v37  ;;  %v712_v37 = vmul.f32 %v1594_v7, %v1594_v7  ;;  %v736_v7 = vmul.f32 %v1621_v40, %v1621_v40  ;;  %vm2786_vm10 = vmmov %vm2647_vm0 }
  0x8d   : > { %v740_v29 = vmul.f32 %v2784_v19, %v2784_v19  ;;  %v741_v59 = vmul.f32 %v2785_v0, %v2785_v0  ;;  %v742_v13 = vmul.f32 %v1655_v46, %v1655_v46  ;;  %v743_v40 = vmul.f32 %v1669_v49, %v1669_v49  ;;  %vm2787_vm11 = vmmov %vm2647_vm0 }
  0x8e   : > { %v764_v5 = vsel %vm2786_vm10, %v700_v62, 0.0  ;;  %v765_v31 = vsel %vm2787_vm11, %v701_v14, 0.0  ;;  %vm2789_vm12 = vmmov %vm2647_vm0  ;;  %v745_v0 = vmul.f32 %v2790_v22, %v2790_v22  ;;  %v746_v46 = vmul.f32 %v1686_v50, %v1686_v50  ;;  %v2791_v14 = vld [vmem:[#allocation47_spill] sm:$0xff]  ;;  %v2793_v22 = vld [vmem:[#allocation49_spill] sm:$0xff] }
  0x8f   : > { %v766_v15 = vadd.f32 %v765_v31, %v764_v5  ;;  %v767_v19 = vsel %vm2789_vm12, %v702_v42, 0.0  ;;  %v747_v49 = vmul.f32 %v1691_v51, %v1691_v51  ;;  %v769_v62 = vsel %vm2647_vm0, %v703_v55, 0.0  ;;  %v2794_v50 = vld [vmem:[#allocation50_spill] sm:$0xff]  ;;  %vm2795_vm1 = vmmov %vm2647_vm0 }
  0x90   : > { %v607_v17 = vadd.f32 %v606_v24, %v605_v25  ;;  %v748_v12 = vmul.f32 %v2791_v14, %v2791_v14  ;;  %v749_v5 = vmul.f32 %v2792_v53, %v2792_v53  ;;  %v750_v42 = vmul.f32 %v1711_v54, %v1711_v54  ;;  %v2797_v54 = vld [vmem:[#allocation8_spill] sm:$0xff]  ;;  %vm2798_vm2 = vmmov %vm2647_vm0 }
  0x91   : > { %v768_v31 = vadd.f32 %v767_v19, %v766_v15  ;;  %v751_v39 = vmul.f32 %v2793_v22, %v2793_v22  ;;  %v752_v10 = vmul.f32 %v2794_v50, %v2794_v50  ;;  %v771_v51 = vsel %vm2795_vm1, %v704_v30, 0.0  ;;  %v2796_v15 = vld [vmem:[#allocation7_spill] sm:$0xff]  ;;  %v2799_v30 = vld [vmem:[#allocation9_spill] sm:$0xff]  ;;  %vm2802_vm4 = vmmov %vm2647_vm0 }
  0x92   : > { %v609_v55 = vadd.f32 %v608_v63, %v607_v17  ;;  %v753_v24 = vmul.f32 %v1728_v56, %v1728_v56  ;;  %v754_v25 = vmul.f32 %v1733_v57, %v1733_v57  ;;  %v755_v19 = vmul.f32 %v2796_v15, %v2796_v15  ;;  %vm2804_vm3 = vmmov %vm2647_vm0 }
  0x93   : > { %v770_v14 = vadd.f32 %v769_v62, %v768_v31  ;;  %v756_v53 = vmul.f32 %v2797_v54, %v2797_v54  ;;  %v757_v22 = vmul.f32 %v1750_v41, %v1750_v41  ;;  %v773_v50 = vsel %vm2798_vm2, %v705_v21, 0.0  ;;  %v2800_v31 = vld [vmem:[#allocation10_spill] sm:$0xff]  ;;  %v2801_v54 = vld [vmem:[#allocation11_spill] sm:$0xff]  ;;  %vm2805_vm6 = vmmov %vm2647_vm0 }
  0x94   : > { %v611_v17 = vadd.f32 %v2089_v38, %v609_v55  ;;  %v758_v56 = vmul.f32 %v1755_v45, %v1755_v45  ;;  %v759_v57 = vmul.f32 %v2799_v30, %v2799_v30  ;;  %v760_v62 = vmul.f32 %v1765_v48, %v1765_v48  ;;  %v2803_v55 = vld [vmem:[#allocation12_spill] sm:$0xff]  ;;  %vm2806_vm7 = vmmov %vm2647_vm0 }
  0x95   : > { %v772_v63 = vadd.f32 %v771_v51, %v770_v14  ;;  %v761_v15 = vmul.f32 %v2800_v31, %v2800_v31  ;;  %v762_v41 = vmul.f32 %v2801_v54, %v2801_v54  ;;  %v775_v21 = vsel %vm2802_vm4, %v706_v36, 0.0  ;;  %vm2807_vm8 = vmmov %vm2647_vm0 }
  0x96   : > { %v613_v38 = vadd.f32 %v2093_v60, %v611_v17  ;;  %v763_v45 = vmul.f32 %v2803_v55, %v2803_v55  ;;  %v777_v30 = vsel %vm2804_vm3, %v707_v9, 0.0  ;;  %v779_v51 = vsel %vm2805_vm6, %v708_v11, 0.0  ;;  %vm2808_vm13 = vmmov %vm2647_vm0  ;;  %v2843_v55 = vld [vmem:[#allocation61_spill] sm:$0xff] }
  0x97   : > { %v774_v20 = vadd.f32 %v773_v50, %v772_v63  ;;  %v781_v48 = vsel %vm2806_vm7, %v709_v2, 0.0  ;;  %v783_v14 = vsel %vm2807_vm8, %v710_v4, 0.0  ;;  %v785_v31 = vsel %vm2808_vm13, %v711_v35, 0.0  ;;  %vm2809_vm14 = vmmov %vm2647_vm0  ;;  %v2811_v50 = vld [vmem:[#allocation22_spill] sm:$0xff] }
  0x98   : > { %v615_v54 = vadd.f32 %v2097_v16, %v613_v38  ;;  %v787_v36 = vsel %vm2809_vm14, %v712_v37, 0.0  ;;  %vm2810_vm15 = vmmov %vm2647_vm0  ;;  %vm278_vm5 = vcmp.lt.s32.totalorder %v2811_v50, %v1298_v33  ;;  %v2254_v37 = vsel %vm2647_vm0, %v738_v47, 0.0 }
  0x99   : > { %v776_v18 = vadd.f32 %v775_v21, %v774_v20  ;;  %v2236_v60 = vsel %vm2810_vm15, %v733_v1, 0.0  ;;  %vm2812_vm9 = vmmov %vm2647_vm0 }
  0x9a   : > { %v2241_v9 = vsel %vm2812_vm9, %v734_v34, 0.0  ;;  %vm2813_vm10 = vmmov %vm2647_vm0  ;;  %v617_v16 = vadd.f32 %v2101_v26, %v615_v54 }
  0x9b   : > { %v2244_v2 = vsel %vm2813_vm10, %v735_v6, 0.0  ;;  %vm2814_vm11 = vmmov %vm2647_vm0  ;;  %v778_v35 = vadd.f32 %v777_v30, %v776_v18  ;;  %v2844_v30 = vld [vmem:[#allocation35_spill] sm:$0xff] }
  0x9c   : > { %v2247_v4 = vsel %vm2814_vm11, %v736_v7, 0.0  ;;  %vm2815_vm12 = vmmov %vm2647_vm0  ;;  %v619_v18 = vadd.f32 %v2105_v44, %v617_v16  ;;  %v2849_v16 = vld [vmem:[#allocation23_spill] sm:$0xff] }
  0x9d   : > { %v2250_v11 = vsel %vm2815_vm12, %v737_v8, 0.0  ;;  %vm2816_vm1 = vmmov %vm2647_vm0  ;;  %v780_v26 = vadd.f32 %v779_v51, %v778_v35 }
  0x9e   : > { %v2257_v20 = vsel %vm2816_vm1, %v739_v61, 0.0  ;;  %vm2817_vm2 = vmmov %vm2647_vm0  ;;  %v621_v44 = vadd.f32 %v2109_v27, %v619_v18 }
  0x9f   : > { %v2260_v1 = vsel %vm2817_vm2, %v740_v29, 0.0  ;;  %vm2818_vm4 = vmmov %vm2647_vm0 }
  0xa0   : > { %v2263_v34 = vsel %vm2818_vm4, %v741_v59, 0.0  ;;  %vm2819_vm3 = vmmov %vm2647_vm0  ;;  %v623_v27 = vadd.f32 %v2113_v32, %v621_v44 }
  0xa1   : > { %v2266_v6 = vsel %vm2819_vm3, %v742_v13, 0.0  ;;  %vm2820_vm6 = vmmov %vm2647_vm0 }
  0xa2   : > { %v2269_v7 = vsel %vm2820_vm6, %v743_v40, 0.0  ;;  %vm2821_vm7 = vmmov %vm2647_vm0  ;;  %v782_v40 = vadd.f32 %v781_v48, %v780_v26  ;;  %v625_v32 = vadd.f32 %v2117_v52, %v623_v27  ;;  %v2850_v26 = vld [vmem:[#allocation64_spill] sm:$0xff] }
  0xa3   : > { %v2273_v8 = vsel %vm2821_vm7, %v744_v43, 0.0  ;;  %vm2822_vm8 = vmmov %vm2647_vm0  ;;  %v719_v44 = vmul.f32 %v2850_v26, %v2850_v26  ;;  %v2852_v27 = vld [vmem:[#allocation24_spill] sm:$0xff] }
  0xa4   : > { %v2276_v61 = vsel %vm2822_vm8, %v745_v0, 0.0  ;;  %vm2823_vm13 = vmmov %vm2647_vm0  ;;  %v784_v17 = vadd.f32 %v783_v14, %v782_v40 }
  0xa5   : > { %v2279_v29 = vsel %vm2823_vm13, %v746_v46, 0.0  ;;  %vm2824_vm14 = vmmov %vm2647_vm0 }
  0xa6   : > { %v2282_v59 = vsel %vm2824_vm14, %v747_v49, 0.0  ;;  %vm2825_vm15 = vmmov %vm2647_vm0  ;;  %v2301_v49 = vsel %vm2647_vm0, %v753_v24, 0.0 }
  0xa7   : > { %v2285_v47 = vsel %vm2825_vm15, %v748_v12, 0.0  ;;  %vm2826_vm9 = vmmov %vm2647_vm0 }
  0xa8   : > { %v2288_v13 = vsel %vm2826_vm9, %v749_v5, 0.0  ;;  %vm2827_vm10 = vmmov %vm2647_vm0 }
  0xa9   : > { %v2292_v43 = vsel %vm2827_vm10, %v750_v42, 0.0  ;;  %vm2828_vm11 = vmmov %vm2647_vm0 }
  0xaa   : > { %v2295_v0 = vsel %vm2828_vm11, %v751_v39, 0.0  ;;  %vm2829_vm12 = vmmov %vm2647_vm0 }
  0xab   : > { %v2298_v46 = vsel %vm2829_vm12, %v752_v10, 0.0  ;;  %vm2830_vm1 = vmmov %vm2647_vm0  ;;  %v342_v10 = vld [vmem:[%s1047_s16 + $0x100] sm:$0xff] }
  0xac   : > { %v2304_v12 = vsel %vm2830_vm1, %v754_v25, 0.0  ;;  %vm2831_vm2 = vmmov %vm2647_vm0  ;;  %v2345_v52 = vsel %vm278_vm5, %v342_v10, 0.0 }
  0xad   : > { %v2307_v5 = vsel %vm2831_vm2, %v755_v19, 0.0  ;;  %vm2832_vm4 = vmmov %vm2647_vm0 }
  0xae   : > { %v2311_v42 = vsel %vm2832_vm4, %v756_v53, 0.0  ;;  %vm2833_vm3 = vmmov %vm2647_vm0  ;;  %v786_v53 = vadd.f32 %v785_v31, %v784_v17 }
  0xaf   : > { %v2314_v39 = vsel %vm2833_vm3, %v757_v22, 0.0  ;;  %vm2834_vm6 = vmmov %vm2647_vm0 }
  0xb0   : > { %v2318_v63 = vsel %vm2834_vm6, %v758_v56, 0.0  ;;  %vm2835_vm7 = vmmov %vm2647_vm0 }
  0xb1   : > { %v2321_v24 = vsel %vm2835_vm7, %v759_v57, 0.0  ;;  %vm2836_vm8 = vmmov %vm2647_vm0  ;;  %v715_v57 = vmul.f32 %v1972_v58, %v1972_v58 }
  0xb2   : > { %v2324_v25 = vsel %vm2836_vm8, %v760_v62, 0.0  ;;  %vm2837_vm13 = vmmov %vm2647_vm0 }
  0xb3   : > { %v2327_v19 = vsel %vm2837_vm13, %v761_v15, 0.0  ;;  %vm2838_vm14 = vmmov %vm2647_vm0  ;;  %v627_v15 = vadd.f32 %v2121_v28, %v625_v32  ;;  %v793_v33 = vsel %vm2647_vm0, %v715_v57, 0.0  ;;  %v2847_v28 = vld [vmem:[#allocation63_spill] sm:$0xff]  ;;  %v2853_v32 = vld [vmem:[#allocation65_spill] sm:$0xff] }
  0xb4   : > { %v2331_v21 = vsel %vm2838_vm14, %v762_v41, 0.0  ;;  %vm2839_vm15 = vmmov %vm2647_vm0  ;;  %v788_v41 = vadd.f32 %v787_v36, %v786_v53  ;;  %v718_v36 = vmul.f32 %v2847_v28, %v2847_v28  ;;  %v720_v53 = vmul.f32 %v2853_v32, %v2853_v32  ;;  %v2855_v57 = vld [vmem:[#allocation13_spill] sm:$0xff] }
  0xb5   : > { %v2334_v22 = vsel %vm2839_vm15, %v763_v45, 0.0  ;;  %vm2840_vm9 = vmmov %vm2647_vm0  ;;  %v716_v45 = vmul.f32 %v2843_v55, %v2843_v55 }
  0xb6   : > { %v628_v56 = vsel %vm2840_vm9, %v2069_v3, 0.0  ;;  %vm2841_vm10 = vmmov %vm2647_vm0 }
  0xb7   : > { %v789_v62 = vsel %vm2841_vm10, %v2151_v23, 0.0  ;;  %vm2842_vm11 = vmmov %vm2647_vm0  ;;  %v629_v51 = vadd.f32 %v628_v56, %v627_v15  ;;  %v2846_v23 = vld [vmem:[#allocation62_spill] sm:$0xff] }
  0xb8   : > { %v630_v38 = vsel %vm2842_vm11, %v2345_v52, 0.0  ;;  %vm2845_vm12 = vmmov %vm2647_vm0  ;;  %v790_v48 = vadd.f32 %v789_v62, %v788_v41  ;;  %v717_v14 = vmul.f32 %v2846_v23, %v2846_v23  ;;  %v2856_v41 = vld [vmem:[#allocation66_spill] sm:$0xff] }
  0xb9   : > { %v791_v58 = vsel %vm2845_vm12, %v2844_v30, 0.0  ;;  %v631_v31 = vadd.f32 %v630_v38, %v629_v51  ;;  %vm2848_vm5 = vmmov %vm2647_vm0  ;;  %v721_v38 = vmul.f32 %v2856_v41, %v2856_v41  ;;  %v2859_v51 = vld [vmem:[#allocation67_spill] sm:$0xff] }
  0xba   : > { %v792_v54 = vadd.f32 %v791_v58, %v790_v48  ;;  %v795_v50 = vsel %vm2848_vm5, %v716_v45, 0.0  ;;  %vm2851_vm1 = vmmov %vm2647_vm0  ;;  %v2858_v45 = vld [vmem:[#allocation14_spill] sm:$0xff]  ;;  %v722_v48 = vmul.f32 %v2859_v51, %v2859_v51 }
  0xbb   : > { %v633_v35 = vadd.f32 %v2849_v16, %v631_v31  ;;  %v797_v40 = vsel %vm2851_vm1, %v717_v14, 0.0  ;;  %vm2854_vm2 = vmmov %vm2647_vm0  ;;  %v2861_v14 = vld [vmem:[#allocation15_spill] sm:$0xff]  ;;  %vm897_vm1 = vcmask 1040384  }
  0xbc   : > { %v794_v18 = vadd.f32 %v793_v33, %v792_v54  ;;  %v799_v56 = vsel %vm2854_vm2, %v718_v36, 0.0  ;;  %vm2857_vm4 = vmmov %vm2647_vm0  ;;  %v2862_v54 = vld [vmem:[#allocation68_spill] sm:$0xff]  ;;  %vm901_vm2 = vcmask 123904  }
  0xbd   : > { %v635_v17 = vadd.f32 %v2852_v27, %v633_v35  ;;  %v801_v55 = vsel %vm2857_vm4, %v719_v44, 0.0  ;;  %vm2860_vm3 = vmmov %vm2647_vm0  ;;  %v723_v28 = vmul.f32 %v2862_v54, %v2862_v54 }
  0xbe   : > { %v796_v10 = vadd.f32 %v795_v50, %v794_v18  ;;  %v803_v23 = vsel %vm2860_vm3, %v720_v53, 0.0  ;;  %vm2863_vm6 = vmmov %vm2647_vm0  ;;  %v2864_v50 = vld [vmem:[#allocation25_spill] sm:$0xff] }
  0xbf   : > { %v637_v62 = vadd.f32 %v2855_v57, %v635_v17  ;;  %v805_v36 = vsel %vm2863_vm6, %v721_v38, 0.0  ;;  %v2865_v18 = vld [vmem:[#allocation69_spill] sm:$0xff]  ;;  %vm2866_vm7 = vmmov %vm2647_vm0 }
  0xc0   : > { %v798_v15 = vadd.f32 %v797_v40, %v796_v10  ;;  %v724_v26 = vmul.f32 %v2865_v18, %v2865_v18  ;;  %v807_v44 = vsel %vm2866_vm7, %v722_v48, 0.0  ;;  %v2867_v40 = vld [vmem:[#allocation26_spill] sm:$0xff]  ;;  %vm2869_vm8 = vmmov %vm2647_vm0 }
  0xc1   : > { %v639_v30 = vadd.f32 %v2858_v45, %v637_v62  ;;  %v2868_v10 = vld [vmem:[#allocation70_spill] sm:$0xff]  ;;  %v809_v53 = vsel %vm2869_vm8, %v723_v28, 0.0  ;;  %vm2872_vm13 = vmmov %vm2647_vm0 }
  0xc2   : > { %v800_v58 = vadd.f32 %v799_v56, %v798_v15  ;;  %v725_v32 = vmul.f32 %v2868_v10, %v2868_v10  ;;  %v2870_v56 = vld [vmem:[#allocation27_spill] sm:$0xff]  ;;  %v811_v38 = vsel %vm2872_vm13, %v724_v26, 0.0  ;;  %vm2875_vm14 = vmmov %vm2647_vm0 }
  0xc3   : > { %v641_v33 = vadd.f32 %v2861_v14, %v639_v30  ;;  %v2871_v15 = vld [vmem:[#allocation71_spill] sm:$0xff]  ;;  %vm2878_vm15 = vmmov %vm2647_vm0 }
  0xc4   : > { %v802_v31 = vadd.f32 %v801_v55, %v800_v58  ;;  %v726_v41 = vmul.f32 %v2871_v15, %v2871_v15  ;;  %v2873_v55 = vld [vmem:[#allocation28_spill] sm:$0xff]  ;;  %v813_v48 = vsel %vm2875_vm14, %v725_v32, 0.0  ;;  %vm2881_vm9 = vmmov %vm2647_vm0 }
  0xc5   : > { %v643_v16 = vadd.f32 %v2864_v50, %v641_v33  ;;  %v2874_v58 = vld [vmem:[#allocation72_spill] sm:$0xff]  ;;  %vm2884_vm10 = vmmov %vm2647_vm0 }
  0xc6   : > { %v804_v35 = vadd.f32 %v803_v23, %v802_v31  ;;  %v727_v51 = vmul.f32 %v2874_v58, %v2874_v58  ;;  %v2876_v23 = vld [vmem:[#allocation29_spill] sm:$0xff]  ;;  %v815_v28 = vsel %vm2878_vm15, %v726_v41, 0.0  ;;  %vm2886_vm11 = vmmov %vm2647_vm0  ;;  %v2889_v58 = vld [vmem:[#allocation16_spill] sm:$0xff] }
  0xc7   : > { %v645_v27 = vadd.f32 %v2867_v40, %v643_v16  ;;  %v2877_v31 = vld [vmem:[#allocation73_spill] sm:$0xff]  ;;  %vm2888_vm12 = vmmov %vm2647_vm0 }
  0xc8   : > { %v806_v17 = vadd.f32 %v805_v36, %v804_v35  ;;  %v728_v54 = vmul.f32 %v2877_v31, %v2877_v31  ;;  %v2879_v36 = vld [vmem:[#allocation30_spill] sm:$0xff]  ;;  %v817_v26 = vsel %vm2881_vm9, %v727_v51, 0.0  ;;  %v2887_v41 = vld [vmem:[#allocation33_spill] sm:$0xff]  ;;  %vm2891_vm5 = vmmov %vm2647_vm0 }
  0xc9   : > { %v647_v57 = vadd.f32 %v2870_v56, %v645_v27  ;;  %v2880_v35 = vld [vmem:[#allocation74_spill] sm:$0xff] }
  0xca   : > { %v808_v62 = vadd.f32 %v807_v44, %v806_v17  ;;  %v729_v18 = vmul.f32 %v2880_v35, %v2880_v35  ;;  %v2882_v44 = vld [vmem:[#allocation31_spill] sm:$0xff]  ;;  %v819_v32 = vsel %vm2884_vm10, %v728_v54, 0.0  ;;  %v2892_v54 = vld [vmem:[#allocation18_spill] sm:$0xff] }
  0xcb   : > { %v649_v45 = vadd.f32 %v2873_v55, %v647_v57  ;;  %v2883_v17 = vld [vmem:[#allocation75_spill] sm:$0xff] }
  0xcc   : > { %v810_v30 = vadd.f32 %v809_v53, %v808_v62  ;;  %v730_v10 = vmul.f32 %v2883_v17, %v2883_v17  ;;  %v2885_v53 = vld [vmem:[#allocation32_spill] sm:$0xff]  ;;  %v731_v62 = vmul.f32 %v2069_v3, %v2069_v3  ;;  %v821_v15 = vsel %vm2886_vm11, %v729_v18, 0.0  ;;  %v2894_v18 = vld [vmem:[#allocation19_spill] sm:$0xff]  ;;  %v2896_v17 = vld [vmem:[#allocation21_spill] sm:$0xff] }
  0xcd   : > { %v651_v14 = vadd.f32 %v2876_v23, %v649_v45  ;;  %v732_v45 = vmul.f32 %v2345_v52, %v2345_v52 }
  0xce   : > { %v812_v33 = vadd.f32 %v811_v38, %v810_v30  ;;  %v823_v30 = vsel %vm2888_vm12, %v730_v10, 0.0  ;;  %v825_v23 = vsel %vm2647_vm0, %v731_v62, 0.0  ;;  %v2898_v62 = vld [vmem:[#allocation52_spill] sm:$0xff] }
  0xcf   : > { %v653_v50 = vadd.f32 %v2879_v36, %v651_v14  ;;  %v2890_v14 = vld [vmem:[#allocation17_spill] sm:$0xff]  ;;  %v827_v3 = vsel %vm2891_vm5, %v732_v45, 0.0  ;;  %v2900_v45 = vld [vmem:[#allocation54_spill] sm:$0xff] }
  0xd0   : > { %v814_v16 = vadd.f32 %v813_v48, %v812_v33 }
  0xd1   : > { %v655_v40 = vadd.f32 %v2882_v44, %v653_v50  ;;  %v2893_v50 = vld [vmem:[#allocation34_spill] sm:$0xff]  ;;  %v2895_v44 = vld [vmem:[#allocation20_spill] sm:$0xff] }
  0xd2   : > { %v816_v27 = vadd.f32 %v815_v28, %v814_v16 }
  0xd3   : > { %v657_v56 = vadd.f32 %v2885_v53, %v655_v40  ;;  %v2897_v53 = vld [vmem:[#allocation51_spill] sm:$0xff] }
  0xd4   : > { %v818_v57 = vadd.f32 %v817_v26, %v816_v27 }
  0xd5   : > { %v659_v38 = vadd.f32 %v2887_v41, %v657_v56 }
  0xd6   : > { %v820_v55 = vadd.f32 %v819_v32, %v818_v57 }
  0xd7   : > { %v661_v51 = vadd.f32 %v2889_v58, %v659_v38  ;;  %v2899_v38 = vld [vmem:[#allocation53_spill] sm:$0xff]  ;;  %v2901_v58 = vld [vmem:[#allocation55_spill] sm:$0xff] }
  0xd8   : > { %v822_v48 = vadd.f32 %v821_v15, %v820_v55 }
  0xd9   : > { %v663_v33 = vadd.f32 %v2890_v14, %v661_v51  ;;  %v2903_v14 = vld [vmem:[#allocation57_spill] sm:$0xff] }
  0xda   : > { %v824_v31 = vadd.f32 %v823_v30, %v822_v48  ;;  %v2902_v48 = vld [vmem:[#allocation56_spill] sm:$0xff] }
  0xdb   : > { %v665_v28 = vadd.f32 %v2892_v54, %v663_v33  ;;  %v2905_v54 = vld [vmem:[#allocation59_spill] sm:$0xff] }
  0xdc   : > { %v826_v36 = vadd.f32 %v825_v23, %v824_v31  ;;  %v2904_v31 = vld [vmem:[#allocation58_spill] sm:$0xff] }
  0xdd   : > { %v667_v16 = vadd.f32 %v2893_v50, %v665_v28 }
  0xde   : > { %v828_v35 = vadd.f32 %v827_v3, %v826_v36  ;;  %v2906_v36 = vld [vmem:[#allocation60_spill] sm:$0xff] }
  0xdf   : > { %v669_v52 = vadd.f32 %v2894_v18, %v667_v16 }
  0xe0   : > { %v830_v26 = vadd.f32 %v2236_v60, %v828_v35 }
  0xe1   : > { %v671_v40 = vadd.f32 %v2895_v44, %v669_v52 }
  0xe2   : > { %v832_v27 = vadd.f32 %v2241_v9, %v830_v26 }
  0xe3   : > { %v673_v10 = vadd.f32 %v2896_v17, %v671_v40 }
  0xe4   : > { %v834_v32 = vadd.f32 %v2244_v2, %v832_v27 }
  0xe5   : > { %v675_v56 = vadd.f32 %v2897_v53, %v673_v10 }
  0xe6   : > { %v836_v57 = vadd.f32 %v2247_v4, %v834_v32 }
  0xe7   : > { %v677_v15 = vadd.f32 %v2898_v62, %v675_v56 }
  0xe8   : > { %v838_v41 = vadd.f32 %v2250_v11, %v836_v57 }
  0xe9   : > { %v679_v55 = vadd.f32 %v2899_v38, %v677_v15 }
  0xea   : > { %v840_v60 = vadd.f32 %v2254_v37, %v838_v41 }
  0xeb   : > { %v681_v30 = vadd.f32 %v2900_v45, %v679_v55 }
  0xec   : > { %v842_v9 = vadd.f32 %v2257_v20, %v840_v60 }
  0xed   : > { %v683_v51 = vadd.f32 %v2901_v58, %v681_v30 }
  0xee   : > { %v844_v2 = vadd.f32 %v2260_v1, %v842_v9 }
  0xef   : > { %v685_v23 = vadd.f32 %v2902_v48, %v683_v51 }
  0xf0   : > { %v846_v4 = vadd.f32 %v2263_v34, %v844_v2 }
  0xf1   : > { %v687_v33 = vadd.f32 %v2903_v14, %v685_v23 }
  0xf2   : > { %v848_v11 = vadd.f32 %v2266_v6, %v846_v4 }
  0xf3   : > { %v689_v3 = vadd.f32 %v2904_v31, %v687_v33 }
  0xf4   : > { %v850_v37 = vadd.f32 %v2269_v7, %v848_v11 }
  0xf5   : > { %v691_v28 = vadd.f32 %v2905_v54, %v689_v3 }
  0xf6   : > { %v852_v20 = vadd.f32 %v2273_v8, %v850_v37 }
  0xf7   : > { %v693_v50 = vadd.f32 %v2906_v36, %v691_v28 }
  0xf8   : > { %v854_v1 = vadd.f32 %v2276_v61, %v852_v20 }
  0xf9   : > { %v694_v44 = vrot.slane %v693_v50, 4 }
  0xfa   : > { %v856_v16 = vadd.f32 %v2279_v29, %v854_v1 }
  0xfc   : > { %v858_v34 = vadd.f32 %v2282_v59, %v856_v16 }
  0xfe   : > { %v860_v35 = vadd.f32 %v2285_v47, %v858_v34 }
 0x100   : > { %v862_v6 = vadd.f32 %v2288_v13, %v860_v35 }
 0x102   : > { %v864_v18 = vadd.f32 %v2292_v43, %v862_v6  ;;  %v695_v43 = vadd.f32 %v694_v44, %v693_v50 }
 0x104   : > { %v866_v7 = vadd.f32 %v2295_v0, %v864_v18  ;;  %v696_v40 = vrot.slane %v695_v43, 2 }
 0x106   : > { %v868_v52 = vadd.f32 %v2298_v46, %v866_v7 }
 0x108   : > { %v870_v8 = vadd.f32 %v2301_v49, %v868_v52 }
 0x10a   : > { %v872_v26 = vadd.f32 %v2304_v12, %v870_v8 }
 0x10c   : > { %v874_v61 = vadd.f32 %v2307_v5, %v872_v26  ;;  %v697_v5 = vadd.f32 %v696_v40, %v695_v43 }
 0x10e   : > { %v876_v29 = vadd.f32 %v2311_v42, %v874_v61 }
 0x110   : > { %v878_v59 = vadd.f32 %v2314_v39, %v876_v29  ;;  %v698_v39 = vrot.slane %v697_v5, 1 }
 0x112   : > { %v880_v47 = vadd.f32 %v2318_v63, %v878_v59  ;;  %v699_v63 = vadd.f32 %v698_v39, %v697_v5 }
 0x114   : > { %v882_v13 = vadd.f32 %v2321_v24, %v880_v47 }
 0x116   : > { %v884_v0 = vadd.f32 %v2324_v25, %v882_v13  ;;  %v899_v25 = vld [vmem:[#allocation4] sm:$0x3] }
 0x118   : > { %v886_v46 = vadd.f32 %v2327_v19, %v884_v0 }
 0x11a   : > { %v888_v49 = vadd.f32 %v2331_v21, %v886_v46 }
 0x11c   : > { %v890_v12 = vadd.f32 %v2334_v22, %v888_v49 }
 0x11e   : > { %v891_v42 = vrot.slane %v890_v12, 4 }
 0x120   : > { %v892_v27 = vadd.f32 %v891_v42, %v890_v12 }
 0x122   : > { %v893_v17 = vrot.slane %v892_v27, 2 }
 0x124   : > { %v894_v10 = vadd.f32 %v893_v17, %v892_v27 }
 0x126   : > { %v895_v24 = vrot.slane %v894_v10, 1 }
 0x128   : > { %v896_v32 = vadd.f32 %v895_v24, %v894_v10 }
 0x12a   : > { %v898_v19 = vsel %vm897_vm1, %v699_v63, %v896_v32 }
 0x12b   : > { %v900_v21 = vadd.f32 %v899_v25, %v898_v19 }
 0x12d   : > { %902 = vst.msk [vmem:[#allocation4] sm:$0x3] %vm901_vm2, %v900_v21 }
 0x12e   : > { %990 = shalt.err (!%p987_p12)
}
 0x12f   : > { %962 = dma.vmem_to_hbm [thread:$0]  (%p965_p5), %s911_s20, 32, %s2483_s2, [#allocation5]  }
 0x130   : > { %1006 = dma.done.wait (%p965_p5), [#allocation5], 32  }
 0x131   : > { %1008 = vsyncadd (%p965_p5), [#allocation5], 4294967264 }
 0x132 PF: > { %s14_s11 = sadd.s32 1, %s1011_s11  }
 0x133   : > { %p11_p13 = scmp.ge.s32.totalorder %s14_s11, 4  }
 0x135   :  { %13 = sbr.rel (!%p11_p13) target bundleno = 3 (0x3), region = 55 }
 0x13a   :  { %923 = vsyncpa [#allocation5], 1 }
 0x13b   :  { %925 = vsyncpa [#allocation5 + $0x1], 1 }

</bundles_post_ra>
